<compile_context>
chip_gen: v7x
topology: tpu7x:2x2x1
jax: 0.10.0
libtpu: 0.0.40
codegen_flags: <defaults>
</compile_context>

<pallas_src>
import functools

import jax
import jax.numpy as jnp
from jax import lax
from jax.experimental import pallas as pl
from jax.experimental.pallas import tpu as pltpu


# -------------------- generation-dependent tiling constants --------------------
def _tpu_vmem_bytes():
    try:
        return int(pltpu.get_tpu_info().vmem_capacity_bytes)
    except Exception:
        return 64 * 1024 * 1024          # unknown -> assume the smallest (v7x-like) VMEM


_VMEM_CAP = _tpu_vmem_bytes()
if _VMEM_CAP >= 100 * 1024 * 1024:       # v5e / v6e: 128 MiB physical VMEM
    VMEM_LIMIT = 100 * 1024 * 1024
    MAX_ROW_TILE = 1024
else:                                    # v7x: 64 MiB physical VMEM
    VMEM_LIMIT = 48 * 1024 * 1024
    MAX_ROW_TILE = 512


# -------------------- in-kernel helpers --------------------
def _sigmoid(v, approx=True):
    # approx=True moves the divide to the EUP (vrcp); exact form only for the classifier output.
    if approx:
        return pl.reciprocal(1.0 + jnp.exp(-v), approx=True)
    return 1.0 / (1.0 + jnp.exp(-v))


def _act(y, act):
    if act == "swish":
        return y * _sigmoid(y)
    return y


# -------------------- Pallas kernels --------------------
def _mm_kernel(x_ref, w_ref, b_ref, o_ref, *, act):
    # one M-tile of act(X @ W + bias); BN scale pre-folded into W; bf16 MXU operands, f32 acc
    y = jnp.dot(x_ref[...], w_ref[...], preferred_element_type=jnp.float32) + b_ref[...]
    o_ref[...] = _act(y, act).astype(o_ref.dtype)


def _proj_kernel(x_ref, g_ref, w_ref, b_ref, o_ref):
    # projection 1x1 conv with the SE gate fused on the input channels (bf16 gate, no f32 temp)
    xg = x_ref[0] * g_ref[0].astype(jnp.bfloat16)
    y = jnp.dot(xg, w_ref[...], preferred_element_type=jnp.float32) + b_ref[...]
    o_ref[0] = y.astype(o_ref.dtype)


def _proj_res_kernel(x_ref, g_ref, w_ref, b_ref, r_ref, o_ref):
    # same + fused MBConv skip connection (residual buffer aliased to the output)
    xg = x_ref[0] * g_ref[0].astype(jnp.bfloat16)
    y = jnp.dot(xg, w_ref[...], preferred_element_type=jnp.float32) + b_ref[...]
    y = y + r_ref[0].astype(jnp.float32)
    o_ref[0] = y.astype(o_ref.dtype)


def _dw_kernel(x_ref, w_ref, b_ref, sw1_ref, sb1_ref, sw2_ref, sb2_ref, y_ref, g_ref,
               *, K, S, Hq, Ho, Wo):
    # Depthwise KxK stride-S conv (stride folded in via phase decomposition) + folded BN + swish,
    # with the whole SE (squeeze + excitation FCs + gate) computed as a free epilogue.
    # x_ref: (1, S*S*Hq, Wq, C) phase-stacked padded input of one batch item, bf16 (no upcast).
    C = y_ref.shape[-1]
    w_all = w_ref[...]                                    # (K*K, C) f32, hoisted out of tap loop
    acc = None
    for ky in range(K):
        for kx in range(K):
            q = (ky % S) * S + (kx % S)                   # stride phase
            dy, dx = ky // S, kx // S                     # offset inside that phase
            patch = x_ref[0, q * Hq + dy:q * Hq + dy + Ho, dx:dx + Wo, :]   # bf16 window
            term = patch * w_all[ky * K + kx]             # lazy bf16*f32 -> f32
            acc = term if acc is None else acc + term     # init from first tap (no zeros+add)
    y = acc + b_ref[...]
    y = y * _sigmoid(y)
    y_ref[0] = y.astype(y_ref.dtype)
    # SE squeeze + excitation, fused: pooled vector already in VMEM, FC weights are tiny.
    pooled = y.reshape(-1, C).mean(axis=0, keepdims=True)                      # (1, C) f32
    h = jnp.dot(pooled, sw1_ref[...], preferred_element_type=jnp.float32) + sb1_ref[...]
    h = h * _sigmoid(h)
    g = jnp.dot(h, sw2_ref[...], preferred_element_type=jnp.float32) + sb2_ref[...]
    g_ref[0] = _sigmoid(g)


def _head_kernel(x_ref, w_ref, b_ref, fw_ref, fb_ref, o_ref):
    # head 1x1 conv + folded BN + swish + global avg pool + FC + sigmoid, one batch item,
    # never materializing the (H*W, 1280) head activation in HBM.
    y = jnp.dot(x_ref[0], w_ref[...], preferred_element_type=jnp.float32) + b_ref[...]
    y = y * _sigmoid(y)
    pooled = jnp.mean(y, axis=0, keepdims=True).astype(jnp.bfloat16)           # (1, HEAD_CH)
    logits = jnp.dot(pooled, fw_ref[...], preferred_element_type=jnp.float32) + fb_ref[...]
    o_ref[0] = _sigmoid(logits, approx=False)     # exact sigmoid: guarantees [0, 1] output


# -------------------- cached pallas_call builders (called under the single outer jit) ----------
@functools.lru_cache(maxsize=None)
def _mm_call(M, Kd, Nd, act, out_dtype):
    tm = M if M <= MAX_ROW_TILE else MAX_ROW_TILE
    return pl.pallas_call(
        functools.partial(_mm_kernel, act=act),
        out_shape=jax.ShapeDtypeStruct((M, Nd), out_dtype),
        grid=(pl.cdiv(M, tm),),
        in_specs=[
            pl.BlockSpec((tm, Kd), lambda i: (i, 0)),
            pl.BlockSpec((Kd, Nd), lambda i: (0, 0)),
            pl.BlockSpec((1, Nd), lambda i: (0, 0)),
        ],
        out_specs=pl.BlockSpec((tm, Nd), lambda i: (i, 0)),
        compiler_params=pltpu.CompilerParams(
            dimension_semantics=("parallel",), vmem_limit_bytes=VMEM_LIMIT),
    )


@functools.lru_cache(maxsize=None)
def _proj_call(N, HW, Cin, Cout, with_res):
    tm = HW if HW <= MAX_ROW_TILE else MAX_ROW_TILE
    in_specs = [
        pl.BlockSpec((1, tm, Cin), lambda n, m: (n, m, 0)),
        pl.BlockSpec((1, 1, Cin), lambda n, m: (n, 0, 0)),
        pl.BlockSpec((Cin, Cout), lambda n, m: (0, 0)),
        pl.BlockSpec((1, Cout), lambda n, m: (0, 0)),
    ]
    kern = _proj_kernel
    io_alias = {}
    if with_res:
        in_specs.append(pl.BlockSpec((1, tm, Cout), lambda n, m: (n, m, 0)))
        kern = _proj_res_kernel
        io_alias = {4: 0}                 # update the residual buffer in place
    return pl.pallas_call(
        kern,
        out_shape=jax.ShapeDtypeStruct((N, HW, Cout), jnp.bfloat16),
        grid=(N, pl.cdiv(HW, tm)),
        in_specs=in_specs,
        out_specs=pl.BlockSpec((1, tm, Cout), lambda n, m: (n, m, 0)),
        input_output_aliases=io_alias,
        compiler_params=pltpu.CompilerParams(
            dimension_semantics=("parallel", "parallel"), vmem_limit_bytes=VMEM_LIMIT),
    )


@functools.lru_cache(maxsize=None)
def _dw_call(N, S, Hq, Wq, C, K, Ho, Wo, Cse):
    # TODO(synk): for very large spectrograms on v7x (64 MiB VMEM), tile Ho into row blocks with a
    #             ceil((K-1)/S)-row halo and accumulate the SE squeeze across tiles.
    return pl.pallas_call(
        functools.partial(_dw_kernel, K=K, S=S, Hq=Hq, Ho=Ho, Wo=Wo),
        out_shape=(jax.ShapeDtypeStruct((N, Ho, Wo, C), jnp.bfloat16),
                   jax.ShapeDtypeStruct((N, 1, C), jnp.float32)),
        grid=(N,),
        in_specs=[
            pl.BlockSpec((1, S * S * Hq, Wq, C), lambda n: (n, 0, 0, 0)),
            pl.BlockSpec((K * K, C), lambda n: (0, 0)),
            pl.BlockSpec((1, C), lambda n: (0, 0)),
            pl.BlockSpec((C, Cse), lambda n: (0, 0)),
            pl.BlockSpec((1, Cse), lambda n: (0, 0)),
            pl.BlockSpec((Cse, C), lambda n: (0, 0)),
            pl.BlockSpec((1, C), lambda n: (0, 0)),
        ],
        out_specs=(pl.BlockSpec((1, Ho, Wo, C), lambda n: (n, 0, 0, 0)),
                   pl.BlockSpec((1, 1, C), lambda n: (n, 0, 0))),
        compiler_params=pltpu.CompilerParams(
            dimension_semantics=("parallel",), vmem_limit_bytes=VMEM_LIMIT),
    )


@functools.lru_cache(maxsize=None)
def _head_call(N, HW, Cin, Chead, P):
    # TODO(synk): tile over HW with a pooled-sum scratch accumulator for very large HW on v7x.
    return pl.pallas_call(
        _head_kernel,
        out_shape=jax.ShapeDtypeStruct((N, 1, P), jnp.float32),
        grid=(N,),
        in_specs=[
            pl.BlockSpec((1, HW, Cin), lambda n: (n, 0, 0)),
            pl.BlockSpec((Cin, Chead), lambda n: (0, 0)),
            pl.BlockSpec((1, Chead), lambda n: (0, 0)),
            pl.BlockSpec((Chead, P), lambda n: (0, 0)),
            pl.BlockSpec((1, P), lambda n: (0, 0)),
        ],
        out_specs=pl.BlockSpec((1, 1, P), lambda n: (n, 0, 0)),
        compiler_params=pltpu.CompilerParams(
            dimension_semantics=("parallel",), vmem_limit_bytes=VMEM_LIMIT),
    )


# -------------------- JAX wrappers (glue, fused under the single outer jit) --------------------
def matmul_bn_act(x2, w, bias, act, out_dtype=jnp.bfloat16):
    M, Kd = x2.shape
    Nd = w.shape[1]
    return _mm_call(M, Kd, Nd, act, out_dtype)(x2, w, bias)


def pointwise_conv(x, w, bias, act):
    N, H, W, Cin = x.shape
    Cout = w.shape[1]
    y = matmul_bn_act(x.reshape(N * H * W, Cin), w, bias, act)
    return y.reshape(N, H, W, Cout)


def depthwise_conv_se(x, w, bias, sw1, sb1, sw2, sb2, K, S):
    # TF-style "same" padding (efficientnet_pytorch Conv2dStaticSamePadding: ph//2 leading pad).
    # Stride is folded into the kernel via a stride-phase decomposition; for S == 1 the padded
    # activation is fed straight to the kernel (no phase slicing / concatenate round trip).
    N, H, W, C = x.shape
    Ho, Wo = -(-H // S), -(-W // S)
    ph = max((Ho - 1) * S + K - H, 0)
    pw = max((Wo - 1) * S + K - W, 0)
    xp = jnp.pad(x, ((0, 0), (ph // 2, ph - ph // 2), (pw // 2, pw - pw // 2), (0, 0)))
    Hq, Wq = Ho + (K - 1) // S, Wo + (K - 1) // S
    if S == 1:
        xph = xp                                           # already (N, Hq, Wq, C)
    else:
        # TODO(synk): avoid this extra HBM round trip by writing the expand conv's output
        #             directly in phase-major layout (or DMA the phases inside the kernel).
        phases = []
        for sy in range(S):
            for sx in range(S):
                p = xp[:, sy::S, sx::S, :][:, :Hq, :Wq, :]
                p = jnp.pad(p, ((0, 0), (0, Hq - p.shape[1]), (0, Wq - p.shape[2]), (0, 0)))
                phases.append(p)
        xph = jnp.concatenate(phases, axis=1)              # (N, S*S*Hq, Wq, C)
    Cse = sw1.shape[1]
    return _dw_call(N, S, Hq, Wq, C, K, Ho, Wo, Cse)(xph, w, bias, sw1, sb1, sw2, sb2)


def proj_conv(x, gate, w, bias, residual=None):
    N, H, W, Cin = x.shape
    Cout = w.shape[1]
    HW = H * W
    x3 = x.reshape(N, HW, Cin)
    if residual is None:
        y = _proj_call(N, HW, Cin, Cout, False)(x3, gate, w, bias)
    else:
        y = _proj_call(N, HW, Cin, Cout, True)(x3, gate, w, bias,
                                               residual.reshape(N, HW, Cout))
    return y.reshape(N, H, W, Cout)


def im2col(x, K, stride):
    # VALID (padding=0) patch extraction, matching nn.Conv2d(1, 32, k=3, s=2) stem in the spec.
    # TODO(synk): replace with an in-kernel 9-tap VPU stem conv to avoid the 9x HBM amplification.
    N, H, W, Cin = x.shape
    Ho = (H - K) // stride + 1
    Wo = (W - K) // stride + 1
    cols = []
    for ky in range(K):
        for kx in range(K):
            cols.append(x[:, ky:ky + stride * (Ho - 1) + 1:stride,
                          kx:kx + stride * (Wo - 1) + 1:stride, :])
    return jnp.concatenate(cols, axis=-1), Ho, Wo


# -------------------- EfficientNet-b0 configuration / parameters --------------------
# (expand_ratio, kernel, stride, c_in, c_out, repeats) -- standard b0 MBConv stages
B0_BLOCKS = [
    (1, 3, 1, 32, 16, 1),
    (6, 3, 2, 16, 24, 2),
    (6, 5, 2, 24, 40, 2),
    (6, 3, 2, 40, 80, 3),
    (6, 5, 1, 80, 112, 3),
    (6, 5, 2, 112, 192, 4),
    (6, 3, 1, 192, 320, 1),
]
SE_RATIO = 0.25
STEM_CH = 32
HEAD_CH = 1280


def block_configs():
    cfgs = []
    for expand, k, s, cin, cout, reps in B0_BLOCKS:
        for r in range(reps):
            cfgs.append({"expand": expand, "k": k,
                         "stride": s if r == 0 else 1,
                         "cin": cin if r == 0 else cout, "cout": cout})
    return tuple(cfgs)


BLOCK_CFGS = block_configs()   # static Python config; params below hold arrays only


def init_params(key, n_labels):
    kit = iter(jax.random.split(key, 1024))

    def nrm(shape, fan_in):
        return jax.random.normal(next(kit), shape, jnp.float32) / jnp.sqrt(float(fan_in))

    def bn(c):
        # inference BatchNorm: scale = gamma/sqrt(var+eps), bias = beta - mean*scale
        s = 1.0 + 0.05 * jax.random.normal(next(kit), (1, c), jnp.float32)
        b = 0.05 * jax.random.normal(next(kit), (1, c), jnp.float32)
        return s, b

    def fold(w, c, dtype=jnp.bfloat16):
        # fold the BN scale into the preceding conv weights; only the bias survives as an operand
        s, b = bn(c)
        return (w * s).astype(dtype), b

    params = {}
    params["stem_w"], params["stem_b"] = fold(nrm((9, STEM_CH), 9), STEM_CH)   # im2col layout
    params["blocks"] = []
    for cfg in BLOCK_CFGS:
        cin, cout, k = cfg["cin"], cfg["cout"], cfg["k"]
        cmid = cin * cfg["expand"]
        cse = max(1, int(cin * SE_RATIO))
        bp = {}
        if cfg["expand"] != 1:
            bp["expand_w"], bp["expand_b"] = fold(nrm((cin, cmid), cin), cmid)
        bp["dw_w"], bp["dw_b"] = fold(nrm((k * k, cmid), k * k), cmid, jnp.float32)
        bp["se_w1"] = nrm((cmid, cse), cmid)
        bp["se_b1"] = jnp.zeros((1, cse), jnp.float32)
        bp["se_w2"] = nrm((cse, cmid), cse)
        bp["se_b2"] = jnp.zeros((1, cmid), jnp.float32)
        bp["proj_w"], bp["proj_b"] = fold(nrm((cmid, cout), cmid), cout)
        params["blocks"].append(bp)
    params["head_w"], params["head_b"] = fold(nrm((320, HEAD_CH), 320), HEAD_CH)
    params["fc_w"] = nrm((HEAD_CH, n_labels), HEAD_CH).astype(jnp.bfloat16)
    params["fc_b"] = 0.05 * jax.random.normal(next(kit), (1, n_labels), jnp.float32)
    return params


# -------------------- forward (== EffNet.forward) --------------------
def effnet_forward(params, x):
    # x: (N, H, W), a batch of Mel spectrograms (torch input before unsqueeze(dim=1))
    x = x.astype(jnp.float32)[..., None]                  # (N, H, W, 1) == unsqueeze channel dim
    N = x.shape[0]

    # stem: Conv2d(1, 32, k=3, s=2, padding=0, bias=False) -> BN(folded) -> swish
    cols, Ho, Wo = im2col(x, 3, 2)
    h = matmul_bn_act(cols.reshape(N * Ho * Wo, 9).astype(jnp.bfloat16),
                      params["stem_w"], params["stem_b"], act="swish")
    h = h.reshape(N, Ho, Wo, STEM_CH)

    # MBConv blocks
    # TODO(synk): dropout / drop_connect are training-only stochastic ops -> identity here
    #             (inference semantics); BatchNorm uses folded running statistics.
    for cfg, bp in zip(BLOCK_CFGS, params["blocks"]):
        inp = h
        if cfg["expand"] != 1:
            h = pointwise_conv(h, bp["expand_w"], bp["expand_b"], act="swish")
        h, gate = depthwise_conv_se(h, bp["dw_w"], bp["dw_b"],
                                    bp["se_w1"], bp["se_b1"], bp["se_w2"], bp["se_b2"],
                                    cfg["k"], cfg["stride"])
        residual = inp if (cfg["stride"] == 1 and cfg["cin"] == cfg["cout"]) else None
        h = proj_conv(h, gate, bp["proj_w"], bp["proj_b"], residual=residual)

    # head: 1x1 conv -> BN(folded) -> swish -> global avg pool -> FC -> sigmoid, fused per item;
    # FC columns padded to a 128-lane multiple for a lane-dense store, sliced afterwards.
    Nh, Hh, Wh, Cin = h.shape
    n_labels = params["fc_w"].shape[1]
    P = max(128, -(-n_labels // 128) * 128)
    fw = jnp.pad(params["fc_w"], ((0, 0), (0, P - n_labels)))
    fb = jnp.pad(params["fc_b"], ((0, 0), (0, P - n_labels)))
    y = _head_call(Nh, Hh * Wh, Cin, HEAD_CH, P)(
        h.reshape(Nh, Hh * Wh, Cin), params["head_w"], params["head_b"], fw, fb)
    return y[:, 0, :n_labels]


effnet_forward_jit = jax.jit(effnet_forward)


def _check_depthwise():
    # numerical check of the stride-phase depthwise decomposition (review correctness concern):
    # K=5, S=2, odd H/W, bf16 activations vs lax.conv_general_dilated in f32.
    key = jax.random.PRNGKey(1)
    kx, kw, kb = jax.random.split(key, 3)
    N, H, W, C, K, S, Cse = 2, 9, 11, 128, 5, 2, 8
    x = jax.random.normal(kx, (N, H, W, C), jnp.float32)
    w = jax.random.normal(kw, (K * K, C), jnp.float32) / float(K)
    b = 0.1 * jax.random.normal(kb, (1, C), jnp.float32)
    sw1 = jnp.zeros((C, Cse), jnp.float32)
    sb1 = jnp.zeros((1, Cse), jnp.float32)
    sw2 = jnp.zeros((Cse, C), jnp.float32)
    sb2 = jnp.zeros((1, C), jnp.float32)
    y, _ = depthwise_conv_se(x.astype(jnp.bfloat16), w, b, sw1, sb1, sw2, sb2, K, S)
    ref = lax.conv_general_dilated(
        x, w.reshape(K, K, 1, C), window_strides=(S, S), padding="SAME",
        dimension_numbers=("NHWC", "HWIO", "NHWC"), feature_group_count=C) + b
    ref = ref * jax.nn.sigmoid(ref)
    err_ok = jnp.allclose(y.astype(jnp.float32), ref, atol=0.1, rtol=0.1)
    assert bool(err_ok), "depthwise stride-phase decomposition mismatch vs lax.conv"


if __name__ == "__main__":
    _check_depthwise()

    n_labels = 8
    key = jax.random.PRNGKey(0)
    pkey, xkey = jax.random.split(key)
    params = init_params(pkey, n_labels)
    x = jax.random.normal(xkey, (2, 32, 32), dtype=jnp.float32)    # (batch, mel_bins, frames)
    y = jax.block_until_ready(effnet_forward_jit(params, x))
    assert y.shape == (2, n_labels)
    assert bool(jnp.all((y >= 0.0) & (y <= 1.0)))
    print("KERNEL_OK")
</pallas_src>

<mosaic_0001>
module attributes {stable_mosaic.version = 11 : i64} {
  func.func @_dw_kernel(%arg0: i32, %arg1: memref<1x28x8x128xbf16, #tpu.memory_space<vmem>>, %arg2: memref<25x128xf32, #tpu.memory_space<vmem>>, %arg3: memref<1x128xf32, #tpu.memory_space<vmem>>, %arg4: memref<128x8xf32, #tpu.memory_space<vmem>>, %arg5: memref<1x8xf32, #tpu.memory_space<vmem>>, %arg6: memref<8x128xf32, #tpu.memory_space<vmem>>, %arg7: memref<1x128xf32, #tpu.memory_space<vmem>>, %arg8: memref<1x5x6x128xbf16, #tpu.memory_space<vmem>>, %arg9: memref<1x1x128xf32, #tpu.memory_space<vmem>>) attributes {dimension_semantics = [#tpu.dimension_semantics<parallel>], iteration_bounds = array<i64: 2>, scalar_prefetch = 0 : i64, scratch_operands = 0 : i64, tpu.core_type = #tpu.core_type<tc>, window_params = [{transform_indices = @transform_0, window_bounds = array<i64: 1, 28, 8, 128>}, {pipeline_mode = #tpu.pipeline_mode<synchronous>, transform_indices = @transform_1, window_bounds = array<i64: 25, 128>}, {pipeline_mode = #tpu.pipeline_mode<synchronous>, transform_indices = @transform_2, window_bounds = array<i64: 1, 128>}, {pipeline_mode = #tpu.pipeline_mode<synchronous>, transform_indices = @transform_3, window_bounds = array<i64: 128, 8>}, {pipeline_mode = #tpu.pipeline_mode<synchronous>, transform_indices = @transform_4, window_bounds = array<i64: 1, 8>}, {pipeline_mode = #tpu.pipeline_mode<synchronous>, transform_indices = @transform_5, window_bounds = array<i64: 8, 128>}, {pipeline_mode = #tpu.pipeline_mode<synchronous>, transform_indices = @transform_6, window_bounds = array<i64: 1, 128>}, {transform_indices = @transform_7, window_bounds = array<i64: 1, 5, 6, 128>}, {transform_indices = @transform_8, window_bounds = array<i64: 1, 1, 128>}]} {
    %c0 = arith.constant 0 : index
    %c0_0 = arith.constant 0 : index
    %0 = vector.load %arg2[%c0, %c0_0] : memref<25x128xf32, #tpu.memory_space<vmem>>, vector<25x128xf32>
    %c0_1 = arith.constant 0 : index
    %c0_2 = arith.constant 0 : index
    %c0_3 = arith.constant 0 : index
    %c0_4 = arith.constant 0 : index
    %1 = vector.load %arg1[%c0_1, %c0_2, %c0_3, %c0_4] : memref<1x28x8x128xbf16, #tpu.memory_space<vmem>>, vector<1x5x6x128xbf16>
    %2 = vector.shape_cast %1 : vector<1x5x6x128xbf16> to vector<5x6x128xbf16>
    %3 = vector.extract_strided_slice %0 {offsets = [0, 0], sizes = [1, 128], strides = [1, 1]} : vector<25x128xf32> to vector<1x128xf32>
    %4 = vector.shape_cast %3 : vector<1x128xf32> to vector<128xf32>
    %5 = arith.extf %2 : vector<5x6x128xbf16> to vector<5x6x128xf32>
    %6 = vector.shape_cast %4 : vector<128xf32> to vector<1x1x128xf32>
    %7 = vector.broadcast %6 : vector<1x1x128xf32> to vector<5x6x128xf32>
    %8 = arith.mulf %5, %7 : vector<5x6x128xf32>
    %c0_5 = arith.constant 0 : index
    %c7 = arith.constant 7 : index
    %c0_6 = arith.constant 0 : index
    %c0_7 = arith.constant 0 : index
    %9 = vector.load %arg1[%c0_5, %c7, %c0_6, %c0_7] : memref<1x28x8x128xbf16, #tpu.memory_space<vmem>>, vector<1x5x6x128xbf16>
    %10 = vector.shape_cast %9 : vector<1x5x6x128xbf16> to vector<5x6x128xbf16>
    %11 = vector.extract_strided_slice %0 {offsets = [1, 0], sizes = [1, 128], strides = [1, 1]} : vector<25x128xf32> to vector<1x128xf32>
    %12 = vector.shape_cast %11 : vector<1x128xf32> to vector<128xf32>
    %13 = arith.extf %10 : vector<5x6x128xbf16> to vector<5x6x128xf32>
    %14 = vector.shape_cast %12 : vector<128xf32> to vector<1x1x128xf32>
    %15 = vector.broadcast %14 : vector<1x1x128xf32> to vector<5x6x128xf32>
    %16 = arith.mulf %13, %15 : vector<5x6x128xf32>
    %17 = arith.addf %8, %16 : vector<5x6x128xf32>
    %c0_8 = arith.constant 0 : index
    %c0_9 = arith.constant 0 : index
    %c1 = arith.constant 1 : index
    %c0_10 = arith.constant 0 : index
    %18 = vector.load %arg1[%c0_8, %c0_9, %c1, %c0_10] : memref<1x28x8x128xbf16, #tpu.memory_space<vmem>>, vector<1x5x6x128xbf16>
    %19 = vector.shape_cast %18 : vector<1x5x6x128xbf16> to vector<5x6x128xbf16>
    %20 = vector.extract_strided_slice %0 {offsets = [2, 0], sizes = [1, 128], strides = [1, 1]} : vector<25x128xf32> to vector<1x128xf32>
    %21 = vector.shape_cast %20 : vector<1x128xf32> to vector<128xf32>
    %22 = arith.extf %19 : vector<5x6x128xbf16> to vector<5x6x128xf32>
    %23 = vector.shape_cast %21 : vector<128xf32> to vector<1x1x128xf32>
    %24 = vector.broadcast %23 : vector<1x1x128xf32> to vector<5x6x128xf32>
    %25 = arith.mulf %22, %24 : vector<5x6x128xf32>
    %26 = arith.addf %17, %25 : vector<5x6x128xf32>
    %c0_11 = arith.constant 0 : index
    %c7_12 = arith.constant 7 : index
    %c1_13 = arith.constant 1 : index
    %c0_14 = arith.constant 0 : index
    %27 = vector.load %arg1[%c0_11, %c7_12, %c1_13, %c0_14] : memref<1x28x8x128xbf16, #tpu.memory_space<vmem>>, vector<1x5x6x128xbf16>
    %28 = vector.shape_cast %27 : vector<1x5x6x128xbf16> to vector<5x6x128xbf16>
    %29 = vector.extract_strided_slice %0 {offsets = [3, 0], sizes = [1, 128], strides = [1, 1]} : vector<25x128xf32> to vector<1x128xf32>
    %30 = vector.shape_cast %29 : vector<1x128xf32> to vector<128xf32>
    %31 = arith.extf %28 : vector<5x6x128xbf16> to vector<5x6x128xf32>
    %32 = vector.shape_cast %30 : vector<128xf32> to vector<1x1x128xf32>
    %33 = vector.broadcast %32 : vector<1x1x128xf32> to vector<5x6x128xf32>
    %34 = arith.mulf %31, %33 : vector<5x6x128xf32>
    %35 = arith.addf %26, %34 : vector<5x6x128xf32>
    %c0_15 = arith.constant 0 : index
    %c0_16 = arith.constant 0 : index
    %c2 = arith.constant 2 : index
    %c0_17 = arith.constant 0 : index
    %36 = vector.load %arg1[%c0_15, %c0_16, %c2, %c0_17] : memref<1x28x8x128xbf16, #tpu.memory_space<vmem>>, vector<1x5x6x128xbf16>
    %37 = vector.shape_cast %36 : vector<1x5x6x128xbf16> to vector<5x6x128xbf16>
    %38 = vector.extract_strided_slice %0 {offsets = [4, 0], sizes = [1, 128], strides = [1, 1]} : vector<25x128xf32> to vector<1x128xf32>
    %39 = vector.shape_cast %38 : vector<1x128xf32> to vector<128xf32>
    %40 = arith.extf %37 : vector<5x6x128xbf16> to vector<5x6x128xf32>
    %41 = vector.shape_cast %39 : vector<128xf32> to vector<1x1x128xf32>
    %42 = vector.broadcast %41 : vector<1x1x128xf32> to vector<5x6x128xf32>
    %43 = arith.mulf %40, %42 : vector<5x6x128xf32>
    %44 = arith.addf %35, %43 : vector<5x6x128xf32>
    %c0_18 = arith.constant 0 : index
    %c14 = arith.constant 14 : index
    %c0_19 = arith.constant 0 : index
    %c0_20 = arith.constant 0 : index
    %45 = vector.load %arg1[%c0_18, %c14, %c0_19, %c0_20] : memref<1x28x8x128xbf16, #tpu.memory_space<vmem>>, vector<1x5x6x128xbf16>
    %46 = vector.shape_cast %45 : vector<1x5x6x128xbf16> to vector<5x6x128xbf16>
    %47 = vector.extract_strided_slice %0 {offsets = [5, 0], sizes = [1, 128], strides = [1, 1]} : vector<25x128xf32> to vector<1x128xf32>
    %48 = vector.shape_cast %47 : vector<1x128xf32> to vector<128xf32>
    %49 = arith.extf %46 : vector<5x6x128xbf16> to vector<5x6x128xf32>
    %50 = vector.shape_cast %48 : vector<128xf32> to vector<1x1x128xf32>
    %51 = vector.broadcast %50 : vector<1x1x128xf32> to vector<5x6x128xf32>
    %52 = arith.mulf %49, %51 : vector<5x6x128xf32>
    %53 = arith.addf %44, %52 : vector<5x6x128xf32>
    %c0_21 = arith.constant 0 : index
    %c21 = arith.constant 21 : index
    %c0_22 = arith.constant 0 : index
    %c0_23 = arith.constant 0 : index
    %54 = vector.load %arg1[%c0_21, %c21, %c0_22, %c0_23] : memref<1x28x8x128xbf16, #tpu.memory_space<vmem>>, vector<1x5x6x128xbf16>
    %55 = vector.shape_cast %54 : vector<1x5x6x128xbf16> to vector<5x6x128xbf16>
    %56 = vector.extract_strided_slice %0 {offsets = [6, 0], sizes = [1, 128], strides = [1, 1]} : vector<25x128xf32> to vector<1x128xf32>
    %57 = vector.shape_cast %56 : vector<1x128xf32> to vector<128xf32>
    %58 = arith.extf %55 : vector<5x6x128xbf16> to vector<5x6x128xf32>
    %59 = vector.shape_cast %57 : vector<128xf32> to vector<1x1x128xf32>
    %60 = vector.broadcast %59 : vector<1x1x128xf32> to vector<5x6x128xf32>
    %61 = arith.mulf %58, %60 : vector<5x6x128xf32>
    %62 = arith.addf %53, %61 : vector<5x6x128xf32>
    %c0_24 = arith.constant 0 : index
    %c14_25 = arith.constant 14 : index
    %c1_26 = arith.constant 1 : index
    %c0_27 = arith.constant 0 : index
    %63 = vector.load %arg1[%c0_24, %c14_25, %c1_26, %c0_27] : memref<1x28x8x128xbf16, #tpu.memory_space<vmem>>, vector<1x5x6x128xbf16>
    %64 = vector.shape_cast %63 : vector<1x5x6x128xbf16> to vector<5x6x128xbf16>
    %65 = vector.extract_strided_slice %0 {offsets = [7, 0], sizes = [1, 128], strides = [1, 1]} : vector<25x128xf32> to vector<1x128xf32>
    %66 = vector.shape_cast %65 : vector<1x128xf32> to vector<128xf32>
    %67 = arith.extf %64 : vector<5x6x128xbf16> to vector<5x6x128xf32>
    %68 = vector.shape_cast %66 : vector<128xf32> to vector<1x1x128xf32>
    %69 = vector.broadcast %68 : vector<1x1x128xf32> to vector<5x6x128xf32>
    %70 = arith.mulf %67, %69 : vector<5x6x128xf32>
    %71 = arith.addf %62, %70 : vector<5x6x128xf32>
    %c0_28 = arith.constant 0 : index
    %c21_29 = arith.constant 21 : index
    %c1_30 = arith.constant 1 : index
    %c0_31 = arith.constant 0 : index
    %72 = vector.load %arg1[%c0_28, %c21_29, %c1_30, %c0_31] : memref<1x28x8x128xbf16, #tpu.memory_space<vmem>>, vector<1x5x6x128xbf16>
    %73 = vector.shape_cast %72 : vector<1x5x6x128xbf16> to vector<5x6x128xbf16>
    %74 = vector.extract_strided_slice %0 {offsets = [8, 0], sizes = [1, 128], strides = [1, 1]} : vector<25x128xf32> to vector<1x128xf32>
    %75 = vector.shape_cast %74 : vector<1x128xf32> to vector<128xf32>
    %76 = arith.extf %73 : vector<5x6x128xbf16> to vector<5x6x128xf32>
    %77 = vector.shape_cast %75 : vector<128xf32> to vector<1x1x128xf32>
    %78 = vector.broadcast %77 : vector<1x1x128xf32> to vector<5x6x128xf32>
    %79 = arith.mulf %76, %78 : vector<5x6x128xf32>
    %80 = arith.addf %71, %79 : vector<5x6x128xf32>
    %c0_32 = arith.constant 0 : index
    %c14_33 = arith.constant 14 : index
    %c2_34 = arith.constant 2 : index
    %c0_35 = arith.constant 0 : index
    %81 = vector.load %arg1[%c0_32, %c14_33, %c2_34, %c0_35] : memref<1x28x8x128xbf16, #tpu.memory_space<vmem>>, vector<1x5x6x128xbf16>
    %82 = vector.shape_cast %81 : vector<1x5x6x128xbf16> to vector<5x6x128xbf16>
    %83 = vector.extract_strided_slice %0 {offsets = [9, 0], sizes = [1, 128], strides = [1, 1]} : vector<25x128xf32> to vector<1x128xf32>
    %84 = vector.shape_cast %83 : vector<1x128xf32> to vector<128xf32>
    %85 = arith.extf %82 : vector<5x6x128xbf16> to vector<5x6x128xf32>
    %86 = vector.shape_cast %84 : vector<128xf32> to vector<1x1x128xf32>
    %87 = vector.broadcast %86 : vector<1x1x128xf32> to vector<5x6x128xf32>
    %88 = arith.mulf %85, %87 : vector<5x6x128xf32>
    %89 = arith.addf %80, %88 : vector<5x6x128xf32>
    %c0_36 = arith.constant 0 : index
    %c1_37 = arith.constant 1 : index
    %c0_38 = arith.constant 0 : index
    %c0_39 = arith.constant 0 : index
    %90 = vector.load %arg1[%c0_36, %c1_37, %c0_38, %c0_39] : memref<1x28x8x128xbf16, #tpu.memory_space<vmem>>, vector<1x5x6x128xbf16>
    %91 = vector.shape_cast %90 : vector<1x5x6x128xbf16> to vector<5x6x128xbf16>
    %92 = vector.extract_strided_slice %0 {offsets = [10, 0], sizes = [1, 128], strides = [1, 1]} : vector<25x128xf32> to vector<1x128xf32>
    %93 = vector.shape_cast %92 : vector<1x128xf32> to vector<128xf32>
    %94 = arith.extf %91 : vector<5x6x128xbf16> to vector<5x6x128xf32>
    %95 = vector.shape_cast %93 : vector<128xf32> to vector<1x1x128xf32>
    %96 = vector.broadcast %95 : vector<1x1x128xf32> to vector<5x6x128xf32>
    %97 = arith.mulf %94, %96 : vector<5x6x128xf32>
    %98 = arith.addf %89, %97 : vector<5x6x128xf32>
    %c0_40 = arith.constant 0 : index
    %c8 = arith.constant 8 : index
    %c0_41 = arith.constant 0 : index
    %c0_42 = arith.constant 0 : index
    %99 = vector.load %arg1[%c0_40, %c8, %c0_41, %c0_42] : memref<1x28x8x128xbf16, #tpu.memory_space<vmem>>, vector<1x5x6x128xbf16>
    %100 = vector.shape_cast %99 : vector<1x5x6x128xbf16> to vector<5x6x128xbf16>
    %101 = vector.extract_strided_slice %0 {offsets = [11, 0], sizes = [1, 128], strides = [1, 1]} : vector<25x128xf32> to vector<1x128xf32>
    %102 = vector.shape_cast %101 : vector<1x128xf32> to vector<128xf32>
    %103 = arith.extf %100 : vector<5x6x128xbf16> to vector<5x6x128xf32>
    %104 = vector.shape_cast %102 : vector<128xf32> to vector<1x1x128xf32>
    %105 = vector.broadcast %104 : vector<1x1x128xf32> to vector<5x6x128xf32>
    %106 = arith.mulf %103, %105 : vector<5x6x128xf32>
    %107 = arith.addf %98, %106 : vector<5x6x128xf32>
    %c0_43 = arith.constant 0 : index
    %c1_44 = arith.constant 1 : index
    %c1_45 = arith.constant 1 : index
    %c0_46 = arith.constant 0 : index
    %108 = vector.load %arg1[%c0_43, %c1_44, %c1_45, %c0_46] : memref<1x28x8x128xbf16, #tpu.memory_space<vmem>>, vector<1x5x6x128xbf16>
    %109 = vector.shape_cast %108 : vector<1x5x6x128xbf16> to vector<5x6x128xbf16>
    %110 = vector.extract_strided_slice %0 {offsets = [12, 0], sizes = [1, 128], strides = [1, 1]} : vector<25x128xf32> to vector<1x128xf32>
    %111 = vector.shape_cast %110 : vector<1x128xf32> to vector<128xf32>
    %112 = arith.extf %109 : vector<5x6x128xbf16> to vector<5x6x128xf32>
    %113 = vector.shape_cast %111 : vector<128xf32> to vector<1x1x128xf32>
    %114 = vector.broadcast %113 : vector<1x1x128xf32> to vector<5x6x128xf32>
    %115 = arith.mulf %112, %114 : vector<5x6x128xf32>
    %116 = arith.addf %107, %115 : vector<5x6x128xf32>
    %c0_47 = arith.constant 0 : index
    %c8_48 = arith.constant 8 : index
    %c1_49 = arith.constant 1 : index
    %c0_50 = arith.constant 0 : index
    %117 = vector.load %arg1[%c0_47, %c8_48, %c1_49, %c0_50] : memref<1x28x8x128xbf16, #tpu.memory_space<vmem>>, vector<1x5x6x128xbf16>
    %118 = vector.shape_cast %117 : vector<1x5x6x128xbf16> to vector<5x6x128xbf16>
    %119 = vector.extract_strided_slice %0 {offsets = [13, 0], sizes = [1, 128], strides = [1, 1]} : vector<25x128xf32> to vector<1x128xf32>
    %120 = vector.shape_cast %119 : vector<1x128xf32> to vector<128xf32>
    %121 = arith.extf %118 : vector<5x6x128xbf16> to vector<5x6x128xf32>
    %122 = vector.shape_cast %120 : vector<128xf32> to vector<1x1x128xf32>
    %123 = vector.broadcast %122 : vector<1x1x128xf32> to vector<5x6x128xf32>
    %124 = arith.mulf %121, %123 : vector<5x6x128xf32>
    %125 = arith.addf %116, %124 : vector<5x6x128xf32>
    %c0_51 = arith.constant 0 : index
    %c1_52 = arith.constant 1 : index
    %c2_53 = arith.constant 2 : index
    %c0_54 = arith.constant 0 : index
    %126 = vector.load %arg1[%c0_51, %c1_52, %c2_53, %c0_54] : memref<1x28x8x128xbf16, #tpu.memory_space<vmem>>, vector<1x5x6x128xbf16>
    %127 = vector.shape_cast %126 : vector<1x5x6x128xbf16> to vector<5x6x128xbf16>
    %128 = vector.extract_strided_slice %0 {offsets = [14, 0], sizes = [1, 128], strides = [1, 1]} : vector<25x128xf32> to vector<1x128xf32>
    %129 = vector.shape_cast %128 : vector<1x128xf32> to vector<128xf32>
    %130 = arith.extf %127 : vector<5x6x128xbf16> to vector<5x6x128xf32>
    %131 = vector.shape_cast %129 : vector<128xf32> to vector<1x1x128xf32>
    %132 = vector.broadcast %131 : vector<1x1x128xf32> to vector<5x6x128xf32>
    %133 = arith.mulf %130, %132 : vector<5x6x128xf32>
    %134 = arith.addf %125, %133 : vector<5x6x128xf32>
    %c0_55 = arith.constant 0 : index
    %c15 = arith.constant 15 : index
    %c0_56 = arith.constant 0 : index
    %c0_57 = arith.constant 0 : index
    %135 = vector.load %arg1[%c0_55, %c15, %c0_56, %c0_57] : memref<1x28x8x128xbf16, #tpu.memory_space<vmem>>, vector<1x5x6x128xbf16>
    %136 = vector.shape_cast %135 : vector<1x5x6x128xbf16> to vector<5x6x128xbf16>
    %137 = vector.extract_strided_slice %0 {offsets = [15, 0], sizes = [1, 128], strides = [1, 1]} : vector<25x128xf32> to vector<1x128xf32>
    %138 = vector.shape_cast %137 : vector<1x128xf32> to vector<128xf32>
    %139 = arith.extf %136 : vector<5x6x128xbf16> to vector<5x6x128xf32>
    %140 = vector.shape_cast %138 : vector<128xf32> to vector<1x1x128xf32>
    %141 = vector.broadcast %140 : vector<1x1x128xf32> to vector<5x6x128xf32>
    %142 = arith.mulf %139, %141 : vector<5x6x128xf32>
    %143 = arith.addf %134, %142 : vector<5x6x128xf32>
    %c0_58 = arith.constant 0 : index
    %c22 = arith.constant 22 : index
    %c0_59 = arith.constant 0 : index
    %c0_60 = arith.constant 0 : index
    %144 = vector.load %arg1[%c0_58, %c22, %c0_59, %c0_60] : memref<1x28x8x128xbf16, #tpu.memory_space<vmem>>, vector<1x5x6x128xbf16>
    %145 = vector.shape_cast %144 : vector<1x5x6x128xbf16> to vector<5x6x128xbf16>
    %146 = vector.extract_strided_slice %0 {offsets = [16, 0], sizes = [1, 128], strides = [1, 1]} : vector<25x128xf32> to vector<1x128xf32>
    %147 = vector.shape_cast %146 : vector<1x128xf32> to vector<128xf32>
    %148 = arith.extf %145 : vector<5x6x128xbf16> to vector<5x6x128xf32>
    %149 = vector.shape_cast %147 : vector<128xf32> to vector<1x1x128xf32>
    %150 = vector.broadcast %149 : vector<1x1x128xf32> to vector<5x6x128xf32>
    %151 = arith.mulf %148, %150 : vector<5x6x128xf32>
    %152 = arith.addf %143, %151 : vector<5x6x128xf32>
    %c0_61 = arith.constant 0 : index
    %c15_62 = arith.constant 15 : index
    %c1_63 = arith.constant 1 : index
    %c0_64 = arith.constant 0 : index
    %153 = vector.load %arg1[%c0_61, %c15_62, %c1_63, %c0_64] : memref<1x28x8x128xbf16, #tpu.memory_space<vmem>>, vector<1x5x6x128xbf16>
    %154 = vector.shape_cast %153 : vector<1x5x6x128xbf16> to vector<5x6x128xbf16>
    %155 = vector.extract_strided_slice %0 {offsets = [17, 0], sizes = [1, 128], strides = [1, 1]} : vector<25x128xf32> to vector<1x128xf32>
    %156 = vector.shape_cast %155 : vector<1x128xf32> to vector<128xf32>
    %157 = arith.extf %154 : vector<5x6x128xbf16> to vector<5x6x128xf32>
    %158 = vector.shape_cast %156 : vector<128xf32> to vector<1x1x128xf32>
    %159 = vector.broadcast %158 : vector<1x1x128xf32> to vector<5x6x128xf32>
    %160 = arith.mulf %157, %159 : vector<5x6x128xf32>
    %161 = arith.addf %152, %160 : vector<5x6x128xf32>
    %c0_65 = arith.constant 0 : index
    %c22_66 = arith.constant 22 : index
    %c1_67 = arith.constant 1 : index
    %c0_68 = arith.constant 0 : index
    %162 = vector.load %arg1[%c0_65, %c22_66, %c1_67, %c0_68] : memref<1x28x8x128xbf16, #tpu.memory_space<vmem>>, vector<1x5x6x128xbf16>
    %163 = vector.shape_cast %162 : vector<1x5x6x128xbf16> to vector<5x6x128xbf16>
    %164 = vector.extract_strided_slice %0 {offsets = [18, 0], sizes = [1, 128], strides = [1, 1]} : vector<25x128xf32> to vector<1x128xf32>
    %165 = vector.shape_cast %164 : vector<1x128xf32> to vector<128xf32>
    %166 = arith.extf %163 : vector<5x6x128xbf16> to vector<5x6x128xf32>
    %167 = vector.shape_cast %165 : vector<128xf32> to vector<1x1x128xf32>
    %168 = vector.broadcast %167 : vector<1x1x128xf32> to vector<5x6x128xf32>
    %169 = arith.mulf %166, %168 : vector<5x6x128xf32>
    %170 = arith.addf %161, %169 : vector<5x6x128xf32>
    %c0_69 = arith.constant 0 : index
    %c15_70 = arith.constant 15 : index
    %c2_71 = arith.constant 2 : index
    %c0_72 = arith.constant 0 : index
    %171 = vector.load %arg1[%c0_69, %c15_70, %c2_71, %c0_72] : memref<1x28x8x128xbf16, #tpu.memory_space<vmem>>, vector<1x5x6x128xbf16>
    %172 = vector.shape_cast %171 : vector<1x5x6x128xbf16> to vector<5x6x128xbf16>
    %173 = vector.extract_strided_slice %0 {offsets = [19, 0], sizes = [1, 128], strides = [1, 1]} : vector<25x128xf32> to vector<1x128xf32>
    %174 = vector.shape_cast %173 : vector<1x128xf32> to vector<128xf32>
    %175 = arith.extf %172 : vector<5x6x128xbf16> to vector<5x6x128xf32>
    %176 = vector.shape_cast %174 : vector<128xf32> to vector<1x1x128xf32>
    %177 = vector.broadcast %176 : vector<1x1x128xf32> to vector<5x6x128xf32>
    %178 = arith.mulf %175, %177 : vector<5x6x128xf32>
    %179 = arith.addf %170, %178 : vector<5x6x128xf32>
    %c0_73 = arith.constant 0 : index
    %c2_74 = arith.constant 2 : index
    %c0_75 = arith.constant 0 : index
    %c0_76 = arith.constant 0 : index
    %180 = vector.load %arg1[%c0_73, %c2_74, %c0_75, %c0_76] : memref<1x28x8x128xbf16, #tpu.memory_space<vmem>>, vector<1x5x6x128xbf16>
    %181 = vector.shape_cast %180 : vector<1x5x6x128xbf16> to vector<5x6x128xbf16>
    %182 = vector.extract_strided_slice %0 {offsets = [20, 0], sizes = [1, 128], strides = [1, 1]} : vector<25x128xf32> to vector<1x128xf32>
    %183 = vector.shape_cast %182 : vector<1x128xf32> to vector<128xf32>
    %184 = arith.extf %181 : vector<5x6x128xbf16> to vector<5x6x128xf32>
    %185 = vector.shape_cast %183 : vector<128xf32> to vector<1x1x128xf32>
    %186 = vector.broadcast %185 : vector<1x1x128xf32> to vector<5x6x128xf32>
    %187 = arith.mulf %184, %186 : vector<5x6x128xf32>
    %188 = arith.addf %179, %187 : vector<5x6x128xf32>
    %c0_77 = arith.constant 0 : index
    %c9 = arith.constant 9 : index
    %c0_78 = arith.constant 0 : index
    %c0_79 = arith.constant 0 : index
    %189 = vector.load %arg1[%c0_77, %c9, %c0_78, %c0_79] : memref<1x28x8x128xbf16, #tpu.memory_space<vmem>>, vector<1x5x6x128xbf16>
    %190 = vector.shape_cast %189 : vector<1x5x6x128xbf16> to vector<5x6x128xbf16>
    %191 = vector.extract_strided_slice %0 {offsets = [21, 0], sizes = [1, 128], strides = [1, 1]} : vector<25x128xf32> to vector<1x128xf32>
    %192 = vector.shape_cast %191 : vector<1x128xf32> to vector<128xf32>
    %193 = arith.extf %190 : vector<5x6x128xbf16> to vector<5x6x128xf32>
    %194 = vector.shape_cast %192 : vector<128xf32> to vector<1x1x128xf32>
    %195 = vector.broadcast %194 : vector<1x1x128xf32> to vector<5x6x128xf32>
    %196 = arith.mulf %193, %195 : vector<5x6x128xf32>
    %197 = arith.addf %188, %196 : vector<5x6x128xf32>
    %c0_80 = arith.constant 0 : index
    %c2_81 = arith.constant 2 : index
    %c1_82 = arith.constant 1 : index
    %c0_83 = arith.constant 0 : index
    %198 = vector.load %arg1[%c0_80, %c2_81, %c1_82, %c0_83] : memref<1x28x8x128xbf16, #tpu.memory_space<vmem>>, vector<1x5x6x128xbf16>
    %199 = vector.shape_cast %198 : vector<1x5x6x128xbf16> to vector<5x6x128xbf16>
    %200 = vector.extract_strided_slice %0 {offsets = [22, 0], sizes = [1, 128], strides = [1, 1]} : vector<25x128xf32> to vector<1x128xf32>
    %201 = vector.shape_cast %200 : vector<1x128xf32> to vector<128xf32>
    %202 = arith.extf %199 : vector<5x6x128xbf16> to vector<5x6x128xf32>
    %203 = vector.shape_cast %201 : vector<128xf32> to vector<1x1x128xf32>
    %204 = vector.broadcast %203 : vector<1x1x128xf32> to vector<5x6x128xf32>
    %205 = arith.mulf %202, %204 : vector<5x6x128xf32>
    %206 = arith.addf %197, %205 : vector<5x6x128xf32>
    %c0_84 = arith.constant 0 : index
    %c9_85 = arith.constant 9 : index
    %c1_86 = arith.constant 1 : index
    %c0_87 = arith.constant 0 : index
    %207 = vector.load %arg1[%c0_84, %c9_85, %c1_86, %c0_87] : memref<1x28x8x128xbf16, #tpu.memory_space<vmem>>, vector<1x5x6x128xbf16>
    %208 = vector.shape_cast %207 : vector<1x5x6x128xbf16> to vector<5x6x128xbf16>
    %209 = vector.extract_strided_slice %0 {offsets = [23, 0], sizes = [1, 128], strides = [1, 1]} : vector<25x128xf32> to vector<1x128xf32>
    %210 = vector.shape_cast %209 : vector<1x128xf32> to vector<128xf32>
    %211 = arith.extf %208 : vector<5x6x128xbf16> to vector<5x6x128xf32>
    %212 = vector.shape_cast %210 : vector<128xf32> to vector<1x1x128xf32>
    %213 = vector.broadcast %212 : vector<1x1x128xf32> to vector<5x6x128xf32>
    %214 = arith.mulf %211, %213 : vector<5x6x128xf32>
    %215 = arith.addf %206, %214 : vector<5x6x128xf32>
    %c0_88 = arith.constant 0 : index
    %c2_89 = arith.constant 2 : index
    %c2_90 = arith.constant 2 : index
    %c0_91 = arith.constant 0 : index
    %216 = vector.load %arg1[%c0_88, %c2_89, %c2_90, %c0_91] : memref<1x28x8x128xbf16, #tpu.memory_space<vmem>>, vector<1x5x6x128xbf16>
    %217 = vector.shape_cast %216 : vector<1x5x6x128xbf16> to vector<5x6x128xbf16>
    %218 = vector.extract_strided_slice %0 {offsets = [24, 0], sizes = [1, 128], strides = [1, 1]} : vector<25x128xf32> to vector<1x128xf32>
    %219 = vector.shape_cast %218 : vector<1x128xf32> to vector<128xf32>
    %220 = arith.extf %217 : vector<5x6x128xbf16> to vector<5x6x128xf32>
    %221 = vector.shape_cast %219 : vector<128xf32> to vector<1x1x128xf32>
    %222 = vector.broadcast %221 : vector<1x1x128xf32> to vector<5x6x128xf32>
    %223 = arith.mulf %220, %222 : vector<5x6x128xf32>
    %224 = arith.addf %215, %223 : vector<5x6x128xf32>
    %c0_92 = arith.constant 0 : index
    %c0_93 = arith.constant 0 : index
    %225 = vector.load %arg3[%c0_92, %c0_93] : memref<1x128xf32, #tpu.memory_space<vmem>>, vector<1x128xf32>
    %226 = vector.shape_cast %225 : vector<1x128xf32> to vector<1x1x128xf32>
    %227 = vector.broadcast %226 : vector<1x1x128xf32> to vector<5x6x128xf32>
    %228 = arith.addf %224, %227 : vector<5x6x128xf32>
    %cst = arith.constant 0.000000e+00 : f32
    %229 = vector.broadcast %cst : f32 to vector<5x6x128xf32>
    %230 = arith.subf %229, %228 : vector<5x6x128xf32>
    %231 = math.exp %230 : vector<5x6x128xf32>
    %cst_94 = arith.constant 1.000000e+00 : f32
    %232 = vector.broadcast %cst_94 : f32 to vector<5x6x128xf32>
    %233 = arith.addf %232, %231 : vector<5x6x128xf32>
    %234 = tpu.reciprocal %233 {approx = true} : vector<5x6x128xf32> -> vector<5x6x128xf32>
    %235 = arith.mulf %228, %234 : vector<5x6x128xf32>
    %236 = arith.truncf %235 : vector<5x6x128xf32> to vector<5x6x128xbf16>
    %c0_95 = arith.constant 0 : index
    %c0_96 = arith.constant 0 : index
    %c0_97 = arith.constant 0 : index
    %c0_98 = arith.constant 0 : index
    %237 = vector.load %arg8[%c0_95, %c0_96, %c0_97, %c0_98] : memref<1x5x6x128xbf16, #tpu.memory_space<vmem>>, vector<1x5x6x128xbf16>
    %238 = vector.shape_cast %237 : vector<1x5x6x128xbf16> to vector<5x6x128xbf16>
    %239 = vector.shape_cast %236 : vector<5x6x128xbf16> to vector<1x5x6x128xbf16>
    tpu.vector_store %arg8[%c0_95, %c0_96, %c0_97, %c0_98], %239 {strides = array<i32>} : memref<1x5x6x128xbf16, #tpu.memory_space<vmem>>, vector<1x5x6x128xbf16>,
    %240 = vector.shape_cast %235 : vector<5x6x128xf32> to vector<30x128xf32>
    %cst_99 = arith.constant dense<0.000000e+00> : vector<128xf32>
    %241 = vector.multi_reduction <add>, %240, %cst_99 [0] : vector<30x128xf32> to vector<128xf32>
    %242 = vector.shape_cast %241 : vector<128xf32> to vector<1x128xf32>
    %cst_100 = arith.constant 3.000000e+01 : f32
    %243 = vector.broadcast %cst_100 : f32 to vector<1x128xf32>
    %244 = arith.divf %242, %243 : vector<1x128xf32>
    %c0_101 = arith.constant 0 : index
    %c0_102 = arith.constant 0 : index
    %245 = vector.load %arg4[%c0_101, %c0_102] : memref<128x8xf32, #tpu.memory_space<vmem>>, vector<128x8xf32>
    %cst_103 = arith.constant dense<0.000000e+00> : vector<1x8xf32>
    %246 = tpu.matmul %244, %245, %cst_103 {dimension_numbers = #tpu.dot_dimension_numbers<[1], [0], [0], [1], [0, 0, 1, 1], [], []>} : vector<1x128xf32>, vector<128x8xf32>, vector<1x8xf32> -> vector<1x8xf32>
    %c0_104 = arith.constant 0 : index
    %c0_105 = arith.constant 0 : index
    %247 = vector.load %arg5[%c0_104, %c0_105] : memref<1x8xf32, #tpu.memory_space<vmem>>, vector<1x8xf32>
    %248 = arith.addf %246, %247 : vector<1x8xf32>
    %cst_106 = arith.constant 0.000000e+00 : f32
    %249 = vector.broadcast %cst_106 : f32 to vector<1x8xf32>
    %250 = arith.subf %249, %248 : vector<1x8xf32>
    %251 = math.exp %250 : vector<1x8xf32>
    %cst_107 = arith.constant 1.000000e+00 : f32
    %252 = vector.broadcast %cst_107 : f32 to vector<1x8xf32>
    %253 = arith.addf %252, %251 : vector<1x8xf32>
    %254 = tpu.reciprocal %253 {approx = true} : vector<1x8xf32> -> vector<1x8xf32>
    %255 = arith.mulf %248, %254 : vector<1x8xf32>
    %c0_108 = arith.constant 0 : index
    %c0_109 = arith.constant 0 : index
    %256 = vector.load %arg6[%c0_108, %c0_109] : memref<8x128xf32, #tpu.memory_space<vmem>>, vector<8x128xf32>
    %cst_110 = arith.constant dense<0.000000e+00> : vector<1x128xf32>
    %257 = tpu.matmul %255, %256, %cst_110 {dimension_numbers = #tpu.dot_dimension_numbers<[1], [0], [0], [1], [0, 0, 1, 1], [], []>} : vector<1x8xf32>, vector<8x128xf32>, vector<1x128xf32> -> vector<1x128xf32>
    %c0_111 = arith.constant 0 : index
    %c0_112 = arith.constant 0 : index
    %258 = vector.load %arg7[%c0_111, %c0_112] : memref<1x128xf32, #tpu.memory_space<vmem>>, vector<1x128xf32>
    %259 = arith.addf %257, %258 : vector<1x128xf32>
    %cst_113 = arith.constant 0.000000e+00 : f32
    %260 = vector.broadcast %cst_113 : f32 to vector<1x128xf32>
    %261 = arith.subf %260, %259 : vector<1x128xf32>
    %262 = math.exp %261 : vector<1x128xf32>
    %cst_114 = arith.constant 1.000000e+00 : f32
    %263 = vector.broadcast %cst_114 : f32 to vector<1x128xf32>
    %264 = arith.addf %263, %262 : vector<1x128xf32>
    %265 = tpu.reciprocal %264 {approx = true} : vector<1x128xf32> -> vector<1x128xf32>
    %c0_115 = arith.constant 0 : index
    %c0_116 = arith.constant 0 : index
    %c0_117 = arith.constant 0 : index
    %266 = vector.load %arg9[%c0_115, %c0_116, %c0_117] : memref<1x1x128xf32, #tpu.memory_space<vmem>>, vector<1x1x128xf32>
    %267 = vector.shape_cast %266 : vector<1x1x128xf32> to vector<1x128xf32>
    %268 = vector.shape_cast %265 : vector<1x128xf32> to vector<1x1x128xf32>
    tpu.vector_store %arg9[%c0_115, %c0_116, %c0_117], %268 {strides = array<i32>} : memref<1x1x128xf32, #tpu.memory_space<vmem>>, vector<1x1x128xf32>,
    return
  }
  func.func @transform_0(%arg0: i32) -> (i32, i32, i32, i32) {
    %c0_i32 = arith.constant 0 : i32
    %c0_i32_0 = arith.constant 0 : i32
    %c0_i32_1 = arith.constant 0 : i32
    %c0_i32_2 = arith.constant 0 : i32
    return %arg0, %c0_i32, %c0_i32_0, %c0_i32_1 : i32, i32, i32, i32
  }
  func.func @transform_1(%arg0: i32) -> (i32, i32) {
    %c0_i32 = arith.constant 0 : i32
    %c0_i32_0 = arith.constant 0 : i32
    %c0_i32_1 = arith.constant 0 : i32
    return %c0_i32, %c0_i32_0 : i32, i32
  }
  func.func @transform_2(%arg0: i32) -> (i32, i32) {
    %c0_i32 = arith.constant 0 : i32
    %c0_i32_0 = arith.constant 0 : i32
    %c0_i32_1 = arith.constant 0 : i32
    return %c0_i32, %c0_i32_0 : i32, i32
  }
  func.func @transform_3(%arg0: i32) -> (i32, i32) {
    %c0_i32 = arith.constant 0 : i32
    %c0_i32_0 = arith.constant 0 : i32
    %c0_i32_1 = arith.constant 0 : i32
    return %c0_i32, %c0_i32_0 : i32, i32
  }
  func.func @transform_4(%arg0: i32) -> (i32, i32) {
    %c0_i32 = arith.constant 0 : i32
    %c0_i32_0 = arith.constant 0 : i32
    %c0_i32_1 = arith.constant 0 : i32
    return %c0_i32, %c0_i32_0 : i32, i32
  }
  func.func @transform_5(%arg0: i32) -> (i32, i32) {
    %c0_i32 = arith.constant 0 : i32
    %c0_i32_0 = arith.constant 0 : i32
    %c0_i32_1 = arith.constant 0 : i32
    return %c0_i32, %c0_i32_0 : i32, i32
  }
  func.func @transform_6(%arg0: i32) -> (i32, i32) {
    %c0_i32 = arith.constant 0 : i32
    %c0_i32_0 = arith.constant 0 : i32
    %c0_i32_1 = arith.constant 0 : i32
    return %c0_i32, %c0_i32_0 : i32, i32
  }
  func.func @transform_7(%arg0: i32) -> (i32, i32, i32, i32) {
    %c0_i32 = arith.constant 0 : i32
    %c0_i32_0 = arith.constant 0 : i32
    %c0_i32_1 = arith.constant 0 : i32
    %c0_i32_2 = arith.constant 0 : i32
    return %arg0, %c0_i32, %c0_i32_0, %c0_i32_1 : i32, i32, i32, i32
  }
  func.func @transform_8(%arg0: i32) -> (i32, i32, i32) {
    %c0_i32 = arith.constant 0 : i32
    %c0_i32_0 = arith.constant 0 : i32
    %c0_i32_1 = arith.constant 0 : i32
    return %arg0, %c0_i32, %c0_i32_0 : i32, i32, i32
  }
}

</mosaic_0001>

<bundles_post_ra>
// kernel: tpu_custom_call.1
= control target key start
LH: loop header
LB: loop body
LE: loop exit
PB: predicated region body
PF: predicated region fallthrough
CT: control target
= control target key end

     0   :  { %14 = vsyncpa [#allocation3], 0  ;;  %s2795_s0 = inlined_call_operand.hbm [shape: bf16[2,28,8,128], index: 0, kind: input, shape index: {}]   ;;  %s2796_s1 = inlined_call_operand.vmem [shape: f32[25,128], index: 1, kind: input, shape index: {}]   ;;  %s2797_s2 = inlined_call_operand.vmem [shape: f32[1,128], index: 2, kind: input, shape index: {}]   ;;  %s2798_s3 = inlined_call_operand.vmem [shape: f32[128,8], index: 3, kind: input, shape index: {}]   ;;  %s2799_s4 = inlined_call_operand.vmem [shape: f32[1,8], index: 4, kind: input, shape index: {}]   ;;  %s2800_s5 = inlined_call_operand.vmem [shape: f32[8,128], index: 5, kind: input, shape index: {}]   ;;  %s2801_s6 = inlined_call_operand.vmem [shape: f32[1,128], index: 6, kind: input, shape index: {}]   ;;  %s2802_s7 = inlined_call_operand.vmem [shape: bf16[2,5,6,128], index: 7, kind: output, shape index: {0}]   ;;  %s2803_s8 = inlined_call_operand.hbm [shape: f32[2,1,128], index: 8, kind: output, shape index: {1}]  }
   0x1   :  { %16 = vsyncpa [#allocation3 + $0x1], 0 }
   0x2   :  { %17 = vsyncpa [#allocation4], 0 }
   0x3   :  { %19 = vsyncpa [#allocation4 + $0x1], 0  ;;  %s2216_s27 = smov 0   ;;  %s2218_s28 = smov 0  }
   0x4   :  { %s2220_s29 = smov 0   ;;  %s2222_s30 = smov 0  }
   0x5 LB: > { %s2237_s9 = sadd.s32 4294967295, %s2161_s30   ;;  %s1677_s10 = sadd.s32 4294967294, %s2161_s30   ;;  %s2161_s30 = sphi %s2222_s30, %s2817_s30   ;;  %s2157_s29 = sphi %s2220_s29, %s2816_s29   ;;  %s2153_s28 = sphi %s2218_s28, %s2815_s28   ;;  %s2149_s27 = sphi %s2216_s27, %s2814_s27  }
   0x6   : > { %s2241_s11 = sadd.s32 1, %s2161_s30   ;;  %s32_s12 = sadd.s32 1, %s2157_s29 }
   0x7   : > { %s29_s13 = ssub.s32 %s2161_s30, %s2241_s11  ;;  %p39_p0 = scmp.ne.s32.totalorder %s2157_s29, %s2153_s28 }
   0x8   : > { %p30_p1 = scmp.eq.s32.totalorder %s29_s13, 0  ;;  %p40_p2 = scmp.eq.s32.totalorder %s2161_s30, 0 }
   0x9   : > { %p45_p3 = scmp.ne.s32.totalorder %s2153_s28, %s2149_s27  ;;  %p46_p4 = scmp.eq.s32.totalorder %s2237_s9, 0 }
   0xa   : > { %s2253_s14 = scalar_select %p30_p1, %s2157_s29, %s32_s12  }
   0xb   : > { %p41_p5 = por %p40_p2, %p39_p0  ;;  %p2255_p6 = por %p46_p4, %p45_p3 }
   0xc   : > { %2805 = sst [smem:[#allocation8_spill]] %s2253_s14  ;;  %p221_p7 = scmp.eq.s32.totalorder %s2237_s9, 1 }
   0xd   : > { %p227_p8 = scmp.eq.s32.totalorder %s1677_s10, 1  ;;  %p1997_p10 = scmp.lt.s32.totalorder %s2161_s30, 2 }
   0xe   : > { %p2262_p11 = por %p221_p7, %p39_p0  ;;  %s265_s18 = sand.u32 1, %s2157_s29  }
   0xf   : > { %p2266_p12 = por %p227_p8, %p45_p3  ;;  %s1982_s19 = smul.u32 1792, %s2161_s30 }
  0x10   : > { %s2807_s16 = scalar_select %p2262_p11, 1, 0 }
  0x11   : > { %s2808_s17 = scalar_select %p2266_p12, 1, 0 }
  0x12   : > { %s1981_s20 = smul.u32 112, %s265_s18  ;;  %s2275_s23 = scalar_lea.hbm %s2795_s0, %s1982_s19 }
  0x13   : > { %p2277_p13 = pnand %p1997_p10, %p41_p5  ;;  %s2283_s10 = scalar_lea.sflag [#allocation3], %s265_s18 }
  0x14   : > { %s269_s25 = scalar_lea.vmem [#allocation2], %s1981_s20  ;;  %s2065_s12 = scalar_lea.hbm %s2275_s23, 1792 }
  0x15   : > { %s276_s26 = sshll.u32 %s269_s25, 4  ;;  %p2066_p0 = scmp.ne.s32.totalorder %s2275_s23, %s2065_s12  ;;  %s2281_s26 = int_to_ptr.vmem [resolvable:$true] %s276_s26 }
  0x16   : > { %p2067_p1 = pneg %p2277_p13  ;;  %s2070_s21 = scalar_lea.hbm %s2795_s0, 3584 }
  0x17   : > { %p2071_p4 = scmp.lt.u32.totalorder %s2275_s23, %s2795_s0  ;;  %p2072_p5 = scmp.lt.u32.totalorder %s2070_s21, %s2065_s12 }
  0x18   : > { %p2068_p2 = pnand %p2067_p1, %p2066_p0  ;;  %p2074_p8 = scmp.lt.u32.totalorder %s2065_s12, %s2275_s23 }
  0x19   : > { %p2073_p7 = por %p2072_p5, %p2071_p4 }
  0x1a   : > { %p2069_p3 = pneg %p2068_p2 }
  0x1b   : > { %p2075_p10 = por %p2074_p8, %p2073_p7 }
  0x1d   : > { %p2076_p9 = pnand %p2075_p10, %p2069_p3 }
  0x1f   : > { %2079 = shalt.err (!%p2076_p9)
}
  0x20   : > { %s2080_s18 = scalar_lea.vmem %s2281_s26, 1792  ;;  %s2163_s20 = smov [#allocation2]  }
  0x21   : > { %p2081_p0 = scmp.ne.s32.totalorder %s2281_s26, %s2080_s18  ;;  %s2085_s25 = sshll.u32 %s2163_s20, 4  ;;  %s2086_s25 = int_to_ptr.vmem [resolvable:$false] %s2085_s25 }
  0x22   : > { %s2087_s14 = scalar_lea.vmem %s2086_s25, 3584  ;;  %p2088_p11 = scmp.lt.s32.totalorder %s2281_s26, %s2086_s25 }
  0x23   : > { %p2083_p2 = pnand %p2081_p0, %p2067_p1  ;;  %p2089_p4 = scmp.lt.s32.totalorder %s2087_s14, %s2080_s18 }
  0x25   : > { %p2084_p12 = pneg %p2083_p2  ;;  %p2090_p5 = por %p2089_p4, %p2088_p11 }
  0x27   : > { %p2091_p7 = pnand %p2090_p5, %p2084_p12 }
  0x29   : > { %2094 = shalt.err (!%p2091_p7)
}
  0x2a   : > { %s2164_s12 = smov 64   ;;  %s2165_s13 = smov 4  }
  0x2b   : > { %1992 = dma.hbm_to_vmem [thread:$0]  (!%p2277_p13), %s2275_s23, 1792, %s2281_s26, %s2283_s10, %s2164_s12, %s2164_s12, %s2165_s13  }
  0x2c   : > { %p1681_p9 = scmp.ge.s32.totalorder %s2161_s30, 1  ;;  %p284_p1 = scmp.lt.s32.totalorder %s2161_s30, 3 }
  0x2e   : > { %p285_p3 = pnand %p1681_p9, %p284_p1 }
  0x2f   : > { %s2314_s19 = sand.u32 (!%p285_p3), 1, %s2153_s28  }
  0x30   : > { %288 = sbr.rel (%p285_p3) target bundleno = 743 (0x2e7), region = 48  ;;  %s291_s22 = scalar_lea.sflag (!%p285_p3), [#allocation3], %s2314_s19 }
  0x31   : > { %s1983_s21 = smul.u32 (!%p285_p3), 112, %s2314_s19 }
  0x33   : > { %s2318_s18 = scalar_lea.vmem (!%p285_p3), [#allocation2], %s1983_s21 }
  0x37   : > { %2140 = dma.done.wait (%p2255_p6), %s291_s22, 1792  }
  0x38   : > { %2142 = vsyncadd (%p2255_p6), %s291_s22, 4294965504  ;;  %v2166_v0 = vmov 0.0|0.0   ;;  %vm2167_vm0 = vmmov 0   ;;  %v2168_v1 = vmov 0.0   ;;  %v350_v2 = vlaneseq  ;;  %v1390_v4 = vld [vmem:[%s2798_s3] sm:$0xff]  ;;  %v1391_v5 = vld [vmem:[%s2798_s3 + $0x8] sm:$0xff] }
  0x39   : > { %1957 = vmatprep.subr.bf16.mxu0 %v2166_v0  ;;  %1949 = vmatprep.mubr.msk.f32.mxu0 %vm2167_vm0, %v2168_v1  ;;  %v1392_v6 = vld [vmem:[%s2798_s3 + $0x10] sm:$0xff]  ;;  %v1958_v7 = vpack.c.bf16 %v1391_v5, %v1390_v4  ;;  %v1393_v8 = vld [vmem:[%s2798_s3 + $0x18] sm:$0xff]  ;;  %v2342_v9 = vld [vmem:[%s2798_s3 + $0x20] sm:$0xff]  ;;  %p331_p6 = scmp.lt.s32.totalorder %s2237_s9, 1  ;;  %vm1379_vm1 = vcmask 1045504   ;;  %vm1485_vm2 = vcmask 64512  }
  0x3a   : > { %1952 = vmatprep.subr.mxu1 %v2168_v1  ;;  %1954 = vmatprep.mubr.msk.f32.mxu1 %vm2167_vm0, %v2168_v1  ;;  %v2325_v3 = vshrl.u32 %v350_v2, 7  ;;  %v1395_v10 = vld [vmem:[%s2798_s3 + $0x28] sm:$0xff]  ;;  %v2350_v11 = vld [vmem:[%s2798_s3 + $0x30] sm:$0xff]  ;;  %v2355_v12 = vld [vmem:[%s2798_s3 + $0x38] sm:$0xff]  ;;  %v1961_v17 = vpack.c.bf16 %v1393_v8, %v1392_v6  ;;  %s330_s15 = scalar_lea.vmem [#allocation5], %s2314_s19  ;;  %p2810_p12 = scmp.ne.s32.totalorder %s2807_s16, 0 }
  0x3b   : > { %v2360_v13 = vld [vmem:[%s2798_s3 + $0x40] sm:$0xff]  ;;  %1959 = vmatpush3.bf16.msra.mxu0 %v1958_v7  ;;  %v2374_v18 = vld [vmem:[%s2798_s3 + $0x48] sm:$0xff]  ;;  %v2379_v19 = vld [vmem:[%s2798_s3 + $0x50] sm:$0xff]  ;;  %v1964_v24 = vpack.c.bf16 %v1395_v10, %v2342_v9  ;;  %v1967_v30 = vpack.c.bf16 %v2355_v12, %v2350_v11  ;;  %s332_s20 = scalar_select %p331_p6, %s2237_s9, 1 }
  0x3c   : > { %v2363_v14 = vsub.s32 0, %v2325_v3  ;;  %v2366_v15 = vsub.s32 1, %v2325_v3  ;;  %v2369_v16 = vsub.s32 2, %v2325_v3  ;;  %v2384_v20 = vld [vmem:[%s2798_s3 + $0x58] sm:$0xff]  ;;  %v2387_v21 = vsub.s32 3, %v2325_v3  ;;  %1960 = vmatprep.subr.bf16.mxu0 %v2166_v0  ;;  %v2400_v25 = vld [vmem:[%s2798_s3 + $0x60] sm:$0xff] }
  0x3d   : > { %v2390_v22 = vsub.s32 4, %v2325_v3  ;;  %v2393_v23 = vsub.s32 5, %v2325_v3  ;;  %v2405_v26 = vld [vmem:[%s2798_s3 + $0x68] sm:$0xff]  ;;  %v2410_v27 = vld [vmem:[%s2798_s3 + $0x70] sm:$0xff]  ;;  %v2413_v28 = vsub.s32 6, %v2325_v3  ;;  %v2416_v29 = vsub.s32 7, %v2325_v3 }
  0x3e   : > { %v1970_v31 = vpack.c.bf16 %v2374_v18, %v2360_v13  ;;  %v1973_v32 = vpack.c.bf16 %v2384_v20, %v2379_v19  ;;  %v1976_v33 = vpack.c.bf16 %v2405_v26, %v2400_v25  ;;  %v2429_v34 = vld [vmem:[%s2798_s3 + $0x78] sm:$0xff]  ;;  %v2434_v35 = vld [vmem:[%s2796_s1] sm:$0xff]  ;;  %s1984_s25 = smul.u32 20, %s332_s20  ;;  %s1586_s20 = sshll.u32 %s330_s15, 4  ;;  %s2753_s20 = int_to_ptr.vmem [resolvable:$true] %s1586_s20 }
  0x3f   : > { %v1979_v36 = vpack.c.bf16 %v2429_v34, %v2410_v27  ;;  %v340_v37 = vld [vmem:[%s2318_s18] sm:$0x7]  ;;  %v353_v38 = vrot.slane %v2434_v35, %v2363_v14  ;;  %v373_v39 = vrot.slane %v2434_v35, %v2366_v15  ;;  %v397_v40 = vrot.slane %v2434_v35, %v2369_v16  ;;  %1962 = vmatpush3.bf16.msra.mxu0 %v1961_v17  ;;  %v341_v41 = vld [vmem:[%s2318_s18 + $0x4] sm:$0x7]  ;;  %v342_v42 = vld [vmem:[%s2318_s18 + $0x8] sm:$0x7] }
  0x40   : > { %v343_v43 = vld [vmem:[%s2318_s18 + $0xc] sm:$0x7]  ;;  %v345_v44 = vunpack.c.l.bf16 %v340_v37  ;;  %v2450_v45 = vrot.slane %v2434_v35, %v2387_v21  ;;  %v2454_v46 = vrot.slane %v2434_v35, %v2390_v22  ;;  %v2458_v47 = vrot.slane %v2434_v35, %v2393_v23  ;;  %1963 = vmatprep.subr.bf16.mxu0 %v2166_v0  ;;  %v344_v48 = vld [vmem:[%s2318_s18 + $0x10] sm:$0x7]  ;;  %v1683_v52 = vld [vmem:[%s2318_s18 + $0x1c] sm:$0x7]  ;;  %s2730_s13 = scalar_lea.vmem %s2802_s7, %s1984_s25 }
  0x41   : > { %v346_v49 = vunpack.c.l.bf16 %v341_v41  ;;  %v347_v50 = vunpack.c.l.bf16 %v342_v42  ;;  %v348_v51 = vunpack.c.l.bf16 %v343_v43  ;;  %v1684_v53 = vld [vmem:[%s2318_s18 + $0x20] sm:$0x7]  ;;  %v2466_v54 = vrot.slane %v2434_v35, %v2413_v28  ;;  %v1685_v57 = vld [vmem:[%s2318_s18 + $0x24] sm:$0x7]  ;;  %v1686_v58 = vld [vmem:[%s2318_s18 + $0x28] sm:$0x7] }
  0x42   : > { %v349_v55 = vunpack.c.l.bf16 %v344_v48  ;;  %v354_v56 = vmul.f32 %v353_v38, %v345_v44  ;;  %v1687_v59 = vld [vmem:[%s2318_s18 + $0x2c] sm:$0x7]  ;;  %v365_v60 = vunpack.c.l.bf16 %v1683_v52  ;;  %v366_v61 = vunpack.c.l.bf16 %v1684_v53  ;;  %v1800_v4 = vld [vmem:[%s2318_s18] sm:$0xff]   ;;  %v388_v10 = vld [vmem:[%s2318_s18 + $0x10] ss:$12 sps:$4 sm:$0xff]   ;;  %s2095_s21 = scalar_lea.vmem %s2753_s20, 16 }
  0x43   : > { %v355_v62 = vmul.f32 %v353_v38, %v346_v49  ;;  %v356_v63 = vmul.f32 %v353_v38, %v347_v50  ;;  %v357_v1 = vmul.f32 %v353_v38, %v348_v51  ;;  %v367_v2 = vunpack.c.l.bf16 %v1685_v57  ;;  %v1879_v5 = vld [vmem:[%s2318_s18 + $0x8] sm:$0xff]   ;;  %1965 = vmatpush3.bf16.msra.mxu0 %v1964_v24  ;;  %v2478_v48 = vld [vmem:[%s2318_s18 + $0x20] sm:$0xff]   ;;  %v1698_v26 = vld [vmem:[%s2318_s18 + $0x54] sm:$0x7]  ;;  %p2096_p11 = scmp.ne.s32.totalorder %s2753_s20, %s2095_s21 }
  0x44   : > { %v358_v6 = vmul.f32 %v353_v38, %v349_v55  ;;  %v368_v7 = vunpack.c.l.bf16 %v1686_v58  ;;  %v369_v8 = vunpack.c.l.bf16 %v1687_v59  ;;  %v374_v9 = vmul.f32 %v373_v39, %v365_v60  ;;  %1966 = vmatprep.subr.bf16.mxu0 %v2166_v0  ;;  %v1881_v51 = vld [vmem:[%s2318_s18 + $0x28] sm:$0xff]  }
  0x45   : > { %v375_v11 = vmul.f32 %v373_v39, %v366_v61  ;;  %v376_v12 = vmul.f32 %v373_v39, %v367_v2  ;;  %v1801_v17 = vunpack.c.l.bf16 %v1800_v4  ;;  %v1802_v37 = vunpack.c.h.bf16 %v1800_v4  ;;  %p2097_p13 = pnand %p2096_p11, %p2810_p12 }
  0x46   : > { %v377_v41 = vmul.f32 %v373_v39, %v368_v7  ;;  %v378_v42 = vmul.f32 %v373_v39, %v369_v8  ;;  %v379_v43 = vadd.f32 %v374_v9, %v354_v56  ;;  %v2475_v44 = vunpack.c.l.bf16 %v1879_v5  ;;  %v462_v8 = vld [vmem:[%s2318_s18] sm:$0xe]  ;;  %v463_v9 = vld [vmem:[%s2318_s18 + $0x4] sm:$0xe] }
  0x47   : > { %v380_v24 = vadd.f32 %v375_v11, %v355_v62  ;;  %v381_v38 = vadd.f32 %v376_v12, %v356_v63  ;;  %v2480_v49 = vunpack.c.h.bf16 %v1879_v5  ;;  %v393_v50 = vunpack.c.l.bf16 %v388_v10  ;;  %1968 = vmatpush3.bf16.msra.mxu0 %v1967_v30  ;;  %v464_v11 = vld [vmem:[%s2318_s18 + $0x8] sm:$0xe]  ;;  %p2098_p8 = pneg %p2097_p13 }
  0x48   : > { %v382_v52 = vadd.f32 %v377_v41, %v357_v1  ;;  %v383_v53 = vadd.f32 %v378_v42, %v358_v6  ;;  %v398_v55 = vmul.f32 %v1801_v17, %v397_v40  ;;  %v399_v57 = vmul.f32 %v1802_v37, %v397_v40  ;;  %1969 = vmatprep.subr.bf16.mxu0 %v2166_v0  ;;  %v465_v42 = vld [vmem:[%s2318_s18 + $0xc] sm:$0xe] }
  0x49   : > { %v400_v39 = vmul.f32 %v2475_v44, %v397_v40  ;;  %v401_v56 = vmul.f32 %v2480_v49, %v397_v40  ;;  %v402_v58 = vmul.f32 %v397_v40, %v393_v50  ;;  %v1809_v59 = vunpack.c.l.bf16 %v2478_v48 }
  0x4a   : > { %v408_v60 = vrot.slane %v398_v55, 1  ;;  %v409_v61 = vrot.slane %v399_v57, 1  ;;  %v1810_v30 = vunpack.c.h.bf16 %v2478_v48  ;;  %v2488_v62 = vunpack.c.l.bf16 %v1881_v51 }
  0x4b   : > { %v410_v63 = vrot.slane %v400_v39, 1  ;;  %v411_v1 = vrot.slane %v401_v56, 1  ;;  %v412_v2 = vrot.slane %v402_v58, 1  ;;  %v2490_v4 = vunpack.c.h.bf16 %v1881_v51  ;;  %1971 = vmatpush3.bf16.msra.mxu0 %v1970_v31 }
  0x4c   : > { %v418_v40 = vadd.f32 %v408_v60, %v379_v43  ;;  %v419_v5 = vadd.f32 %v409_v61, %v380_v24  ;;  %v428_v6 = vunpack.c.h.bf16 %v388_v10  ;;  %v438_v7 = vmul.f32 %v1809_v59, %v2450_v45  ;;  %1972 = vmatprep.subr.bf16.mxu0 %v2166_v0  ;;  %v466_v43 = vld [vmem:[%s2318_s18 + $0x10] sm:$0xe]  ;;  %v1693_v60 = vld [vmem:[%s2318_s18 + $0x38] sm:$0x7]  ;;  %v1694_v61 = vld [vmem:[%s2318_s18 + $0x3c] sm:$0x7] }
  0x4d   : > { %v420_v12 = vadd.f32 %v410_v63, %v381_v38  ;;  %v421_v17 = vadd.f32 %v411_v1, %v382_v52  ;;  %v422_v37 = vadd.f32 %v412_v2, %v383_v53  ;;  %v439_v13 = vmul.f32 %v1810_v30, %v2450_v45  ;;  %v1695_v63 = vld [vmem:[%s2318_s18 + $0x40] sm:$0x7] }
  0x4e   : > { %v437_v18 = vmul.f32 %v2450_v45, %v428_v6  ;;  %v440_v31 = vmul.f32 %v2488_v62, %v2450_v45  ;;  %v441_v10 = vmul.f32 %v2490_v4, %v2450_v45  ;;  %v448_v41 = vrot.slane %v438_v7, 1 }
  0x4f   : > { %v449_v24 = vrot.slane %v439_v13, 1  ;;  %v467_v38 = vunpack.c.l.bf16 %v462_v8  ;;  %v468_v50 = vunpack.c.l.bf16 %v463_v9  ;;  %v469_v51 = vunpack.c.l.bf16 %v464_v11  ;;  %1974 = vmatpush3.bf16.msra.mxu0 %v1973_v32  ;;  %v1696_v8 = vld [vmem:[%s2318_s18 + $0x44] sm:$0x7]  ;;  %v1697_v9 = vld [vmem:[%s2318_s18 + $0x48] sm:$0x7] }
  0x50   : > { %v447_v52 = vrot.slane %v437_v18, 1  ;;  %v450_v53 = vrot.slane %v440_v31, 1  ;;  %v451_v55 = vrot.slane %v441_v10, 1  ;;  %v458_v57 = vadd.f32 %v448_v41, %v419_v5  ;;  %1975 = vmatprep.subr.bf16.mxu0 %v2166_v0 }
  0x51   : > { %v459_v45 = vadd.f32 %v449_v24, %v420_v12  ;;  %v470_v39 = vunpack.c.l.bf16 %v465_v42  ;;  %v471_v56 = vunpack.c.l.bf16 %v466_v43  ;;  %v476_v58 = vmul.f32 %v2454_v46, %v467_v38  ;;  %v1700_v42 = vld [vmem:[%s2318_s18 + $0x5c] sm:$0x7] }
  0x52   : > { %v457_v1 = vadd.f32 %v447_v52, %v418_v40  ;;  %v460_v2 = vadd.f32 %v450_v53, %v421_v17  ;;  %v461_v19 = vadd.f32 %v451_v55, %v422_v37  ;;  %v477_v20 = vmul.f32 %v2454_v46, %v468_v50  ;;  %v1701_v50 = vld [vmem:[%s2318_s18 + $0x60] sm:$0x7] }
  0x53   : > { %v478_v32 = vmul.f32 %v2454_v46, %v469_v51  ;;  %v479_v5 = vmul.f32 %v2454_v46, %v470_v39  ;;  %v480_v6 = vmul.f32 %v2454_v46, %v471_v56  ;;  %v486_v7 = vrot.slane %v476_v58, 2  ;;  %1977 = vmatpush3.bf16.msra.mxu0 %v1976_v33  ;;  %v1699_v33 = vld [vmem:[%s2318_s18 + $0x58] sm:$0x7] }
  0x54   : > { %v487_v40 = vrot.slane %v477_v20, 2  ;;  %v507_v11 = vunpack.c.l.bf16 %v1693_v60  ;;  %v508_v12 = vunpack.c.l.bf16 %v1694_v61  ;;  %v509_v17 = vunpack.c.l.bf16 %v1695_v63  ;;  %1978 = vmatprep.subr.bf16.mxu0 %v2166_v0  ;;  %v1882_v60 = vld [vmem:[%s2318_s18 + $0x38] sm:$0xff]   ;;  %v2545_v61 = vld [vmem:[%s2318_s18 + $0x40] sm:$0xff]   ;;  %v1707_v20 = vld [vmem:[%s2318_s18 + $0x48] ss:$12 sps:$4 sm:$0xff]  }
  0x55   : > { %v488_v37 = vrot.slane %v478_v32, 2  ;;  %v489_v13 = vrot.slane %v479_v5, 2  ;;  %v490_v46 = vrot.slane %v480_v6, 2  ;;  %v496_v18 = vadd.f32 %v486_v7, %v457_v1 }
  0x56   : > { %v497_v31 = vadd.f32 %v487_v40, %v458_v57  ;;  %v510_v10 = vunpack.c.l.bf16 %v1696_v8  ;;  %v511_v41 = vunpack.c.l.bf16 %v1697_v9  ;;  %v516_v25 = vmul.f32 %v2458_v47, %v507_v11  ;;  %v1702_v57 = vld [vmem:[%s2318_s18 + $0x64] sm:$0x7]  ;;  %v2554_v8 = vld [vmem:[%s2318_s18 + $0x58] sm:$0xff]  }
  0x57   : > { %v498_v43 = vadd.f32 %v488_v37, %v459_v45  ;;  %v499_v24 = vadd.f32 %v489_v13, %v460_v2  ;;  %v500_v38 = vadd.f32 %v490_v46, %v461_v19  ;;  %v517_v0 = vmul.f32 %v2458_v47, %v508_v12  ;;  %1980 = vmatpush3.bf16.msra.mxu0 %v1979_v36  ;;  %v2557_v9 = vld [vmem:[%s2318_s18 + $0x60] sm:$0xff]   ;;  %v2563_v37 = vld [vmem:[%s2796_s1 + $0x8] sm:$0xff] }
  0x58   : > { %v518_v51 = vmul.f32 %v2458_v47, %v509_v17  ;;  %v519_v52 = vmul.f32 %v2458_v47, %v510_v10  ;;  %v520_v53 = vmul.f32 %v2458_v47, %v511_v41  ;;  %v521_v55 = vadd.f32 %v516_v25, %v496_v18 }
  0x59   : > { %v522_v45 = vadd.f32 %v517_v0, %v497_v31  ;;  %v532_v39 = vunpack.c.l.bf16 %v1698_v26  ;;  %v533_v56 = vunpack.c.l.bf16 %v1699_v33  ;;  %v534_v58 = vunpack.c.l.bf16 %v1700_v42 }
  0x5a   : > { %v523_v27 = vadd.f32 %v518_v51, %v498_v43  ;;  %v524_v34 = vadd.f32 %v519_v52, %v499_v24  ;;  %v525_v36 = vadd.f32 %v520_v53, %v500_v38  ;;  %v535_v63 = vunpack.c.l.bf16 %v1701_v50 }
  0x5b   : > { %v536_v1 = vunpack.c.l.bf16 %v1702_v57  ;;  %v541_v2 = vmul.f32 %v2466_v54, %v532_v39  ;;  %v542_v47 = vmul.f32 %v2466_v54, %v533_v56  ;;  %v543_v19 = vmul.f32 %v2466_v54, %v534_v58  ;;  %v1713_v56 = vld [vmem:[%s2318_s18 + $0x38] sm:$0xe]  ;;  %v1714_v58 = vld [vmem:[%s2318_s18 + $0x3c] sm:$0xe] }
  0x5c   : > { %v544_v32 = vmul.f32 %v2466_v54, %v535_v63  ;;  %v1817_v5 = vunpack.c.l.bf16 %v1882_v60  ;;  %v1818_v6 = vunpack.c.h.bf16 %v1882_v60  ;;  %v1821_v7 = vunpack.c.l.bf16 %v2545_v61  ;;  %v1715_v63 = vld [vmem:[%s2318_s18 + $0x40] sm:$0xe] }
  0x5d   : > { %v545_v40 = vmul.f32 %v2466_v54, %v536_v1  ;;  %v546_v11 = vadd.f32 %v541_v2, %v521_v55  ;;  %v547_v12 = vadd.f32 %v542_v47, %v522_v45  ;;  %v548_v17 = vadd.f32 %v543_v19, %v523_v27  ;;  %v1716_v1 = vld [vmem:[%s2318_s18 + $0x44] sm:$0xe] }
  0x5e   : > { %v549_v13 = vadd.f32 %v544_v32, %v524_v34  ;;  %v1822_v46 = vunpack.c.h.bf16 %v2545_v61  ;;  %v560_v18 = vunpack.c.l.bf16 %v1707_v20  ;;  %v564_v31 = vrot.slane %v2434_v35, %v2416_v29  ;;  %v1717_v32 = vld [vmem:[%s2318_s18 + $0x48] sm:$0xe] }
  0x5f   : > { %v550_v10 = vadd.f32 %v545_v40, %v525_v36  ;;  %v1825_v41 = vunpack.c.l.bf16 %v2554_v8  ;;  %v1826_v54 = vunpack.c.h.bf16 %v2554_v8  ;;  %v1829_v25 = vunpack.c.l.bf16 %v2557_v9  ;;  %v1767_v8 = vld [vmem:[%s2318_s18 + $0x4c] sm:$0xe] }
  0x60   : > { %v565_v26 = vmul.f32 %v1817_v5, %v564_v31  ;;  %v566_v33 = vmul.f32 %v1818_v6, %v564_v31  ;;  %v567_v42 = vmul.f32 %v1821_v7, %v564_v31  ;;  %v568_v43 = vmul.f32 %v1822_v46, %v564_v31  ;;  %v1718_v5 = vld [vmem:[%s2318_s18 + $0x4] sm:$0x7] }
  0x61   : > { %v569_v24 = vmul.f32 %v564_v31, %v560_v18  ;;  %v1830_v35 = vunpack.c.h.bf16 %v2557_v9  ;;  %v595_v38 = vunpack.c.h.bf16 %v1707_v20  ;;  %v603_v0 = vrot.slane %v2563_v37, %v2363_v14  ;;  %v1770_v9 = vld [vmem:[%s2318_s18 + $0x10] sm:$0x7] }
  0x62   : > { %v575_v50 = vrot.slane %v565_v26, 1  ;;  %v576_v51 = vrot.slane %v566_v33, 1  ;;  %v577_v52 = vrot.slane %v567_v42, 1  ;;  %v578_v53 = vrot.slane %v568_v43, 1  ;;  %v1721_v33 = vld [vmem:[%s2318_s18 + $0x10] sm:$0x7] }
  0x63   : > { %v579_v55 = vrot.slane %v569_v24, 1  ;;  %v604_v57 = vmul.f32 %v603_v0, %v595_v38  ;;  %v605_v45 = vmul.f32 %v1825_v41, %v603_v0  ;;  %v606_v39 = vmul.f32 %v1826_v54, %v603_v0  ;;  %v1722_v42 = vld [vmem:[%s2318_s18 + $0x14] sm:$0x7] }
  0x64   : > { %v585_v60 = vadd.f32 %v575_v50, %v546_v11  ;;  %v586_v27 = vadd.f32 %v576_v51, %v547_v12  ;;  %v587_v34 = vadd.f32 %v577_v52, %v548_v17  ;;  %v588_v36 = vadd.f32 %v578_v53, %v549_v13  ;;  %v1719_v17 = vld [vmem:[%s2318_s18 + $0x8] sm:$0x7]  ;;  %v1720_v13 = vld [vmem:[%s2318_s18 + $0xc] sm:$0x7] }
  0x65   : > { %v589_v2 = vadd.f32 %v579_v55, %v550_v10  ;;  %v607_v47 = vmul.f32 %v1829_v25, %v603_v0  ;;  %v608_v19 = vmul.f32 %v1830_v35, %v603_v0  ;;  %v614_v20 = vrot.slane %v604_v57, 1  ;;  %v1723_v55 = vld [vmem:[%s2318_s18 + $0x20] sm:$0x7]  ;;  %v1724_v57 = vld [vmem:[%s2318_s18 + $0x24] sm:$0x7] }
  0x66   : > { %v615_v6 = vrot.slane %v605_v45, 1  ;;  %v616_v40 = vrot.slane %v606_v39, 1  ;;  %v634_v11 = vunpack.c.l.bf16 %v1713_v56  ;;  %v635_v12 = vunpack.c.l.bf16 %v1714_v58 }
  0x67   : > { %v617_v18 = vrot.slane %v607_v47, 1  ;;  %v618_v31 = vrot.slane %v608_v19, 1  ;;  %v624_v10 = vadd.f32 %v614_v20, %v585_v60  ;;  %v636_v26 = vunpack.c.l.bf16 %v1715_v63 }
  0x68   : > { %v625_v43 = vadd.f32 %v615_v6, %v586_v27  ;;  %v626_v24 = vadd.f32 %v616_v40, %v587_v34  ;;  %v637_v38 = vunpack.c.l.bf16 %v1716_v1  ;;  %v638_v0 = vunpack.c.l.bf16 %v1717_v32  ;;  %v1725_v6 = vld [vmem:[%s2318_s18 + $0x28] sm:$0x7] }
  0x69   : > { %v627_v50 = vadd.f32 %v617_v18, %v588_v36  ;;  %v628_v51 = vadd.f32 %v618_v31, %v589_v2  ;;  %v642_v52 = vrot.slane %v2563_v37, %v2366_v15  ;;  %v674_v53 = vunpack.c.l.bf16 %v1718_v5 }
  0x6a   : > { %v675_v45 = vunpack.c.l.bf16 %v1719_v17  ;;  %v676_v39 = vunpack.c.l.bf16 %v1720_v13  ;;  %v677_v56 = vunpack.c.l.bf16 %v1721_v33  ;;  %v678_v58 = vunpack.c.l.bf16 %v1722_v42  ;;  %v1726_v13 = vld [vmem:[%s2318_s18 + $0x2c] sm:$0x7]  ;;  %v1727_v42 = vld [vmem:[%s2318_s18 + $0x30] sm:$0x7] }
  0x6b   : > { %v643_v60 = vmul.f32 %v642_v52, %v634_v11  ;;  %v644_v63 = vmul.f32 %v642_v52, %v635_v12  ;;  %v645_v27 = vmul.f32 %v642_v52, %v636_v26  ;;  %v646_v34 = vmul.f32 %v642_v52, %v637_v38 }
  0x6c   : > { %v647_v1 = vmul.f32 %v642_v52, %v638_v0  ;;  %v682_v36 = vrot.slane %v2563_v37, %v2369_v16  ;;  %v699_v2 = vunpack.c.l.bf16 %v1723_v55  ;;  %v700_v47 = vunpack.c.l.bf16 %v1724_v57  ;;  %v1728_v57 = vld [vmem:[%s2318_s18 + $0x4] ss:$44 sps:$4 sm:$0xff]  }
  0x6d   : > { %v653_v19 = vrot.slane %v643_v60, 2  ;;  %v654_v20 = vrot.slane %v644_v63, 2  ;;  %v655_v32 = vrot.slane %v645_v27, 2  ;;  %v656_v5 = vrot.slane %v646_v34, 2  ;;  %v2607_v60 = vld [vmem:[%s2318_s18 + $0x10] sm:$0xff]  }
  0x6e   : > { %v657_v40 = vrot.slane %v647_v1, 2  ;;  %v683_v11 = vmul.f32 %v682_v36, %v674_v53  ;;  %v684_v12 = vmul.f32 %v682_v36, %v675_v45  ;;  %v685_v17 = vmul.f32 %v682_v36, %v676_v39 }
  0x6f   : > { %v663_v18 = vadd.f32 %v653_v19, %v624_v10  ;;  %v664_v31 = vadd.f32 %v654_v20, %v625_v43  ;;  %v665_v26 = vadd.f32 %v655_v32, %v626_v24  ;;  %v666_v33 = vadd.f32 %v656_v5, %v627_v50 }
  0x70   : > { %v667_v38 = vadd.f32 %v657_v40, %v628_v51  ;;  %v686_v0 = vmul.f32 %v682_v36, %v677_v56  ;;  %v687_v52 = vmul.f32 %v682_v36, %v678_v58  ;;  %v701_v55 = vunpack.c.l.bf16 %v1725_v6 }
  0x71   : > { %v688_v63 = vadd.f32 %v683_v11, %v663_v18  ;;  %v689_v27 = vadd.f32 %v684_v12, %v664_v31  ;;  %v690_v34 = vadd.f32 %v685_v17, %v665_v26  ;;  %v702_v1 = vunpack.c.l.bf16 %v1726_v13  ;;  %v1738_v13 = vld [vmem:[%s2318_s18 + $0x4] sm:$0xe] }
  0x72   : > { %v691_v53 = vadd.f32 %v686_v0, %v666_v33  ;;  %v692_v45 = vadd.f32 %v687_v52, %v667_v38  ;;  %v703_v39 = vunpack.c.l.bf16 %v1727_v42  ;;  %v707_v10 = vrot.slane %v2563_v37, %v2387_v21 }
  0x73   : > { %v1837_v43 = vunpack.c.l.bf16 %v2607_v60  ;;  %v1838_v24 = vunpack.c.h.bf16 %v2607_v60  ;;  %v723_v50 = vunpack.c.l.bf16 %v1728_v57  ;;  %v731_v51 = vrot.slane %v2563_v37, %v2390_v22 }
  0x74   : > { %v708_v56 = vmul.f32 %v707_v10, %v699_v2  ;;  %v709_v58 = vmul.f32 %v707_v10, %v700_v47  ;;  %v710_v36 = vmul.f32 %v707_v10, %v701_v55  ;;  %v711_v19 = vmul.f32 %v707_v10, %v702_v1 }
  0x75   : > { %v712_v20 = vmul.f32 %v707_v10, %v703_v39  ;;  %v732_v32 = vmul.f32 %v731_v51, %v723_v50  ;;  %v733_v5 = vmul.f32 %v2475_v44, %v731_v51  ;;  %v734_v6 = vmul.f32 %v2480_v49, %v731_v51  ;;  %v1741_v39 = vld [vmem:[%s2318_s18 + $0x10] sm:$0xe] }
  0x76   : > { %v713_v40 = vadd.f32 %v708_v56, %v688_v63  ;;  %v714_v11 = vadd.f32 %v709_v58, %v689_v27  ;;  %v715_v12 = vadd.f32 %v710_v36, %v690_v34  ;;  %v716_v17 = vadd.f32 %v711_v19, %v691_v53  ;;  %v1739_v63 = vld [vmem:[%s2318_s18 + $0x8] sm:$0xe]  ;;  %v1742_v58 = vld [vmem:[%s2318_s18 + $0x14] sm:$0xe] }
  0x77   : > { %v717_v18 = vadd.f32 %v712_v20, %v692_v45  ;;  %v735_v31 = vmul.f32 %v1837_v43, %v731_v51  ;;  %v736_v2 = vmul.f32 %v1838_v24, %v731_v51  ;;  %v742_v47 = vrot.slane %v732_v32, 1 }
  0x78   : > { %v743_v26 = vrot.slane %v733_v5, 1  ;;  %v744_v33 = vrot.slane %v734_v6, 1  ;;  %v766_v42 = vunpack.c.h.bf16 %v1728_v57  ;;  %v770_v38 = vrot.slane %v2563_v37, %v2393_v23  ;;  %v1740_v57 = vld [vmem:[%s2318_s18 + $0xc] sm:$0xe]  ;;  %v1744_v5 = vld [vmem:[%s2318_s18 + $0x40] sm:$0x7] }
  0x79   : > { %v745_v0 = vrot.slane %v735_v31, 1  ;;  %v746_v52 = vrot.slane %v736_v2, 1  ;;  %v752_v55 = vadd.f32 %v742_v47, %v713_v40  ;;  %v801_v27 = vunpack.c.l.bf16 %v1738_v13 }
  0x7a   : > { %v753_v34 = vadd.f32 %v743_v26, %v714_v11  ;;  %v754_v1 = vadd.f32 %v744_v33, %v715_v12  ;;  %v771_v53 = vmul.f32 %v1809_v59, %v770_v38  ;;  %v772_v45 = vmul.f32 %v1810_v30, %v770_v38  ;;  %v1743_v59 = vld [vmem:[%s2318_s18 + $0x3c] sm:$0x7]  ;;  %v1745_v11 = vld [vmem:[%s2318_s18 + $0x44] sm:$0x7]  ;;  %v1746_v12 = vld [vmem:[%s2318_s18 + $0x48] sm:$0x7] }
  0x7b   : > { %v755_v10 = vadd.f32 %v745_v0, %v716_v17  ;;  %v756_v50 = vadd.f32 %v746_v52, %v717_v18  ;;  %v773_v51 = vmul.f32 %v2488_v62, %v770_v38  ;;  %v774_v56 = vmul.f32 %v2490_v4, %v770_v38  ;;  %v1747_v33 = vld [vmem:[%s2318_s18 + $0x4c] sm:$0x7] }
  0x7c   : > { %v775_v36 = vmul.f32 %v770_v38, %v766_v42  ;;  %v781_v19 = vrot.slane %v771_v53, 1  ;;  %v782_v20 = vrot.slane %v772_v45, 1  ;;  %v802_v32 = vunpack.c.l.bf16 %v1739_v63  ;;  %v1748_v38 = vld [vmem:[%s2318_s18 + $0x58] sm:$0x7] }
  0x7d   : > { %v783_v48 = vrot.slane %v773_v51, 1  ;;  %v784_v30 = vrot.slane %v774_v56, 1  ;;  %v803_v6 = vunpack.c.l.bf16 %v1740_v57  ;;  %v804_v40 = vunpack.c.l.bf16 %v1741_v39 }
  0x7e   : > { %v785_v17 = vrot.slane %v775_v36, 1  ;;  %v791_v13 = vadd.f32 %v781_v19, %v752_v55  ;;  %v792_v18 = vadd.f32 %v782_v20, %v753_v34  ;;  %v805_v31 = vunpack.c.l.bf16 %v1742_v58  ;;  %v1749_v19 = vld [vmem:[%s2318_s18 + $0x5c] sm:$0x7] }
  0x7f   : > { %v793_v2 = vadd.f32 %v783_v48, %v754_v1  ;;  %v794_v47 = vadd.f32 %v784_v30, %v755_v10  ;;  %v809_v26 = vrot.slane %v2563_v37, %v2413_v28  ;;  %v841_v42 = vunpack.c.l.bf16 %v1743_v59 }
  0x80   : > { %v795_v0 = vadd.f32 %v785_v17, %v756_v50  ;;  %v842_v52 = vunpack.c.l.bf16 %v1744_v5  ;;  %v843_v63 = vunpack.c.l.bf16 %v1745_v11  ;;  %v844_v53 = vunpack.c.l.bf16 %v1746_v12  ;;  %v1750_v5 = vld [vmem:[%s2318_s18 + $0x60] sm:$0x7]  ;;  %v1752_v11 = vld [vmem:[%s2318_s18 + $0x68] sm:$0x7] }
  0x81   : > { %v810_v45 = vmul.f32 %v809_v26, %v801_v27  ;;  %v811_v57 = vmul.f32 %v809_v26, %v802_v32  ;;  %v812_v39 = vmul.f32 %v809_v26, %v803_v6  ;;  %v813_v55 = vmul.f32 %v809_v26, %v804_v40  ;;  %v1751_v40 = vld [vmem:[%s2318_s18 + $0x64] sm:$0x7] }
  0x82   : > { %v814_v34 = vmul.f32 %v809_v26, %v805_v31  ;;  %v845_v51 = vunpack.c.l.bf16 %v1747_v33  ;;  %v849_v1 = vrot.slane %v2563_v37, %v2416_v29  ;;  %v866_v10 = vunpack.c.l.bf16 %v1748_v38  ;;  %v2651_v12 = vld [vmem:[%s2796_s1 + $0x10] sm:$0xff]  ;;  %v1891_v38 = vld [vmem:[%s2318_s18 + $0x48] sm:$0xff]  }
  0x83   : > { %v820_v56 = vrot.slane %v810_v45, 2  ;;  %v821_v58 = vrot.slane %v811_v57, 2  ;;  %v822_v50 = vrot.slane %v812_v39, 2  ;;  %v823_v36 = vrot.slane %v813_v55, 2  ;;  %v2656_v45 = vld [vmem:[%s2318_s18 + $0x3c] sm:$0xe] }
  0x84   : > { %v824_v20 = vrot.slane %v814_v34, 2  ;;  %v850_v27 = vmul.f32 %v849_v1, %v841_v42  ;;  %v851_v32 = vmul.f32 %v849_v1, %v842_v52  ;;  %v852_v59 = vmul.f32 %v849_v1, %v843_v63  ;;  %v1753_v42 = vld [vmem:[%s2318_s18 + $0x3c] ss:$44 sps:$4 sm:$0xff]  }
  0x85   : > { %v830_v48 = vadd.f32 %v820_v56, %v791_v13  ;;  %v831_v30 = vadd.f32 %v821_v58, %v792_v18  ;;  %v832_v6 = vadd.f32 %v822_v50, %v793_v2  ;;  %v833_v37 = vadd.f32 %v823_v36, %v794_v47 }
  0x86   : > { %v834_v17 = vadd.f32 %v824_v20, %v795_v0  ;;  %v853_v31 = vmul.f32 %v849_v1, %v844_v53  ;;  %v854_v26 = vmul.f32 %v849_v1, %v845_v51  ;;  %v867_v33 = vunpack.c.l.bf16 %v1749_v19 }
  0x87   : > { %v855_v52 = vadd.f32 %v850_v27, %v830_v48  ;;  %v856_v63 = vadd.f32 %v851_v32, %v831_v30  ;;  %v857_v13 = vadd.f32 %v852_v59, %v832_v6  ;;  %v868_v18 = vunpack.c.l.bf16 %v1750_v5 }
  0x88   : > { %v858_v2 = vadd.f32 %v853_v31, %v833_v37  ;;  %v859_v47 = vadd.f32 %v854_v26, %v834_v17  ;;  %v869_v57 = vunpack.c.l.bf16 %v1751_v40  ;;  %v870_v39 = vunpack.c.l.bf16 %v1752_v11 }
  0x89   : > { %v874_v55 = vrot.slane %v2651_v12, %v2363_v14  ;;  %v1853_v34 = vunpack.c.l.bf16 %v1891_v38  ;;  %v1854_v0 = vunpack.c.h.bf16 %v1891_v38  ;;  %v890_v53 = vunpack.c.l.bf16 %v1753_v42 }
  0x8a   : > { %v898_v51 = vrot.slane %v2651_v12, %v2366_v15  ;;  %v933_v1 = vunpack.c.h.bf16 %v1753_v42  ;;  %v937_v56 = vrot.slane %v2651_v12, %v2369_v16  ;;  %v968_v58 = vunpack.c.l.bf16 %v2656_v45 }
  0x8b   : > { %v875_v50 = vmul.f32 %v874_v55, %v866_v10  ;;  %v876_v36 = vmul.f32 %v874_v55, %v867_v33  ;;  %v877_v19 = vmul.f32 %v874_v55, %v868_v18  ;;  %v878_v20 = vmul.f32 %v874_v55, %v869_v57  ;;  %v1764_v33 = vld [vmem:[%s2318_s18 + $0x40] sm:$0xe]  ;;  %v1768_v57 = vld [vmem:[%s2318_s18 + $0x8] sm:$0x7] }
  0x8c   : > { %v879_v27 = vmul.f32 %v874_v55, %v870_v39  ;;  %v899_v32 = vmul.f32 %v898_v51, %v890_v53  ;;  %v900_v14 = vmul.f32 %v1821_v7, %v898_v51  ;;  %v901_v59 = vmul.f32 %v1822_v46, %v898_v51 }
  0x8d   : > { %v880_v5 = vadd.f32 %v875_v50, %v855_v52  ;;  %v881_v15 = vadd.f32 %v876_v36, %v856_v63  ;;  %v882_v48 = vadd.f32 %v877_v19, %v857_v13  ;;  %v883_v30 = vadd.f32 %v878_v20, %v858_v2  ;;  %v1766_v13 = vld [vmem:[%s2318_s18 + $0x48] sm:$0xe]  ;;  %v1772_v50 = vld [vmem:[%s2318_s18 + $0x18] sm:$0x7]  ;;  %v1773_v36 = vld [vmem:[%s2318_s18 + $0x24] sm:$0x7] }
  0x8e   : > { %v884_v16 = vadd.f32 %v879_v27, %v859_v47  ;;  %v902_v6 = vmul.f32 %v1853_v34, %v898_v51  ;;  %v903_v10 = vmul.f32 %v1854_v0, %v898_v51  ;;  %v909_v37 = vrot.slane %v899_v32, 1 }
  0x8f   : > { %v910_v40 = vrot.slane %v900_v14, 1  ;;  %v911_v11 = vrot.slane %v901_v59, 1  ;;  %v938_v7 = vmul.f32 %v1825_v41, %v937_v56  ;;  %v939_v61 = vmul.f32 %v1826_v54, %v937_v56  ;;  %v1765_v41 = vld [vmem:[%s2318_s18 + $0x44] sm:$0xe] }
  0x90   : > { %v912_v46 = vrot.slane %v902_v6, 1  ;;  %v913_v17 = vrot.slane %v903_v10, 1  ;;  %v919_v31 = vadd.f32 %v909_v37, %v880_v5  ;;  %v940_v26 = vmul.f32 %v1829_v25, %v937_v56  ;;  %v1769_v25 = vld [vmem:[%s2318_s18 + $0xc] sm:$0x7] }
  0x91   : > { %v920_v42 = vadd.f32 %v910_v40, %v881_v15  ;;  %v921_v38 = vadd.f32 %v911_v11, %v882_v48  ;;  %v941_v52 = vmul.f32 %v1830_v35, %v937_v56  ;;  %v942_v63 = vmul.f32 %v937_v56, %v933_v1  ;;  %v1771_v56 = vld [vmem:[%s2318_s18 + $0x14] sm:$0x7] }
  0x92   : > { %v922_v54 = vadd.f32 %v912_v46, %v883_v30  ;;  %v923_v18 = vadd.f32 %v913_v17, %v884_v16  ;;  %v948_v2 = vrot.slane %v938_v7, 1  ;;  %v949_v47 = vrot.slane %v939_v61, 1  ;;  %v1774_v7 = vld [vmem:[%s2318_s18 + $0x28] sm:$0x7] }
  0x93   : > { %v950_v39 = vrot.slane %v940_v26, 1  ;;  %v951_v55 = vrot.slane %v941_v52, 1  ;;  %v952_v34 = vrot.slane %v942_v63, 1  ;;  %v969_v0 = vunpack.c.l.bf16 %v1764_v33  ;;  %v1776_v26 = vld [vmem:[%s2318_s18 + $0x30] sm:$0x7] }
  0x94   : > { %v958_v53 = vadd.f32 %v948_v2, %v919_v31  ;;  %v959_v35 = vadd.f32 %v949_v47, %v920_v42  ;;  %v970_v51 = vunpack.c.l.bf16 %v1765_v41  ;;  %v971_v1 = vunpack.c.l.bf16 %v1766_v13  ;;  %v1775_v31 = vld [vmem:[%s2318_s18 + $0x2c] sm:$0x7]  ;;  %v1777_v52 = vld [vmem:[%s2318_s18 + $0x34] sm:$0x7]  ;;  %v1782_v2 = vld [vmem:[%s2318_s18 + $0x18] ss:$12 sps:$4 sm:$0xff]  }
  0x95   : > { %v960_v19 = vadd.f32 %v950_v39, %v921_v38  ;;  %v961_v20 = vadd.f32 %v951_v55, %v922_v54  ;;  %v962_v27 = vadd.f32 %v952_v34, %v923_v18  ;;  %v972_v32 = vunpack.c.l.bf16 %v1767_v8  ;;  %v1897_v55 = vld [vmem:[%s2318_s18 + $0x30] sm:$0xff]  }
  0x96   : > { %v976_v14 = vrot.slane %v2651_v12, %v2387_v21  ;;  %v1008_v59 = vunpack.c.l.bf16 %v1768_v57  ;;  %v1009_v5 = vunpack.c.l.bf16 %v1769_v25  ;;  %v1010_v15 = vunpack.c.l.bf16 %v1770_v9 }
  0x97   : > { %v1011_v48 = vunpack.c.l.bf16 %v1771_v56  ;;  %v1012_v30 = vunpack.c.l.bf16 %v1772_v50  ;;  %v1016_v16 = vrot.slane %v2651_v12, %v2390_v22  ;;  %v1033_v6 = vunpack.c.l.bf16 %v1773_v36 }
  0x98   : > { %v977_v10 = vmul.f32 %v976_v14, %v968_v58  ;;  %v978_v37 = vmul.f32 %v976_v14, %v969_v0  ;;  %v979_v40 = vmul.f32 %v976_v14, %v970_v51  ;;  %v980_v11 = vmul.f32 %v976_v14, %v971_v1 }
  0x99   : > { %v981_v21 = vmul.f32 %v976_v14, %v972_v32  ;;  %v1017_v61 = vmul.f32 %v1016_v16, %v1008_v59  ;;  %v1018_v46 = vmul.f32 %v1016_v16, %v1009_v5  ;;  %v1019_v17 = vmul.f32 %v1016_v16, %v1010_v15 }
  0x9a   : > { %v987_v33 = vrot.slane %v977_v10, 2  ;;  %v988_v42 = vrot.slane %v978_v37, 2  ;;  %v989_v38 = vrot.slane %v979_v40, 2  ;;  %v990_v22 = vrot.slane %v980_v11, 2 }
  0x9b   : > { %v991_v45 = vrot.slane %v981_v21, 2  ;;  %v1020_v63 = vmul.f32 %v1016_v16, %v1011_v48  ;;  %v1021_v58 = vmul.f32 %v1016_v16, %v1012_v30  ;;  %v1034_v41 = vunpack.c.l.bf16 %v1774_v7 }
  0x9c   : > { %v997_v13 = vadd.f32 %v987_v33, %v958_v53  ;;  %v998_v8 = vadd.f32 %v988_v42, %v959_v35  ;;  %v999_v54 = vadd.f32 %v989_v38, %v960_v19  ;;  %v1000_v18 = vadd.f32 %v990_v22, %v961_v20  ;;  %v1790_v33 = vld [vmem:[%s2318_s18 + $0x10] sm:$0xe]  ;;  %v1793_v42 = vld [vmem:[%s2796_s1 + $0x18] ss:$0 sm:$0xff] }
  0x9d   : > { %v1001_v47 = vadd.f32 %v991_v45, %v962_v27  ;;  %v1035_v57 = vunpack.c.l.bf16 %v1775_v31  ;;  %v1036_v25 = vunpack.c.l.bf16 %v1776_v26  ;;  %v1037_v39 = vunpack.c.l.bf16 %v1777_v52  ;;  %v1789_v26 = vld [vmem:[%s2318_s18 + $0xc] sm:$0xe]  ;;  %v1791_v45 = vld [vmem:[%s2318_s18 + $0x14] sm:$0xe] }
  0x9e   : > { %v1022_v34 = vadd.f32 %v1017_v61, %v997_v13  ;;  %v1023_v0 = vadd.f32 %v1018_v46, %v998_v8  ;;  %v1024_v9 = vadd.f32 %v1019_v17, %v999_v54  ;;  %v1025_v51 = vadd.f32 %v1020_v63, %v1000_v18  ;;  %v1788_v46 = vld [vmem:[%s2318_s18 + $0x8] sm:$0xe] }
  0x9f   : > { %v1026_v1 = vadd.f32 %v1021_v58, %v1001_v47  ;;  %v1041_v56 = vrot.slane %v2651_v12, %v2393_v23  ;;  %v1061_v50 = vunpack.c.l.bf16 %v1782_v2  ;;  %v1065_v53 = vrot.slane %v2651_v12, %v2413_v28 }
  0xa0   : > { %v1877_v35 = vunpack.c.l.bf16 %v1897_v55  ;;  %v1878_v36 = vunpack.c.h.bf16 %v1897_v55  ;;  %v1096_v19 = vunpack.c.h.bf16 %v1782_v2  ;;  %v1104_v20 = vrot.slane %v2651_v12, %v2416_v29 }
  0xa1   : > { %v1042_v27 = vmul.f32 %v1041_v56, %v1033_v6  ;;  %v1043_v32 = vmul.f32 %v1041_v56, %v1034_v41  ;;  %v1044_v14 = vmul.f32 %v1041_v56, %v1035_v57  ;;  %v1045_v59 = vmul.f32 %v1041_v56, %v1036_v25  ;;  %v1792_v41 = vld [vmem:[%s2318_s18 + $0x18] sm:$0xe]  ;;  %s1796_s18 = sshll.u32 %s2237_s9, 4  ;;  %s2170_s9 = smov [#allocation5]  }
  0xa2   : > { %v1046_v5 = vmul.f32 %v1041_v56, %v1037_v39  ;;  %v1066_v15 = vmul.f32 %v2475_v44, %v1065_v53  ;;  %v1067_v48 = vmul.f32 %v2480_v49, %v1065_v53  ;;  %v1068_v23 = vmul.f32 %v1837_v43, %v1065_v53  ;;  %s2751_s12 = scalar_lea.hbm %s2803_s8, %s1796_s18  ;;  %s2099_s22 = sshll.u32 %s2170_s9, 4  ;;  %s2100_s22 = int_to_ptr.vmem [resolvable:$false] %s2099_s22 }
  0xa3   : > { %v1047_v30 = vadd.f32 %v1042_v27, %v1022_v34  ;;  %v1048_v28 = vadd.f32 %v1043_v32, %v1023_v0  ;;  %v1049_v16 = vadd.f32 %v1044_v14, %v1024_v9  ;;  %v1050_v10 = vadd.f32 %v1045_v59, %v1025_v51  ;;  %s2101_s23 = scalar_lea.vmem %s2100_s22, 32  ;;  %p2102_p10 = scmp.lt.s32.totalorder %s2753_s20, %s2100_s22 }
  0xa4   : > { %v1051_v37 = vadd.f32 %v1046_v5, %v1026_v1  ;;  %v1069_v29 = vmul.f32 %v1838_v24, %v1065_v53  ;;  %v1070_v12 = vmul.f32 %v1065_v53, %v1061_v50  ;;  %v1076_v6 = vrot.slane %v1066_v15, 1  ;;  %p2103_p0 = scmp.lt.s32.totalorder %s2101_s23, %s2095_s21 }
  0xa5   : > { %v1077_v40 = vrot.slane %v1067_v48, 1  ;;  %v1078_v44 = vrot.slane %v1068_v23, 1  ;;  %v1105_v11 = vmul.f32 %v1104_v20, %v1096_v19  ;;  %v1106_v49 = vmul.f32 %v2488_v62, %v1104_v20 }
  0xa6   : > { %v1079_v7 = vrot.slane %v1069_v29, 1  ;;  %v1080_v43 = vrot.slane %v1070_v12, 1  ;;  %v1086_v21 = vadd.f32 %v1076_v6, %v1047_v30  ;;  %v1107_v61 = vmul.f32 %v2490_v4, %v1104_v20  ;;  %p2104_p2 = por %p2103_p0, %p2102_p10 }
  0xa7   : > { %v1087_v17 = vadd.f32 %v1077_v40, %v1048_v28  ;;  %v1088_v60 = vadd.f32 %v1078_v44, %v1049_v16  ;;  %v1108_v24 = vmul.f32 %v1877_v35, %v1104_v20  ;;  %v1109_v31 = vmul.f32 %v1878_v36, %v1104_v20  ;;  %v1794_v36 = vld [vmem:[%s2797_s2] ss:$0 sm:$0xff] }
  0xa8   : > { %v1089_v38 = vadd.f32 %v1079_v7, %v1050_v10  ;;  %v1090_v62 = vadd.f32 %v1080_v43, %v1051_v37  ;;  %v1115_v22 = vrot.slane %v1105_v11, 1  ;;  %v1116_v52 = vrot.slane %v1106_v49, 1  ;;  %p2105_p4 = pnand %p2104_p2, %p2098_p8 }
  0xa9   : > { %v1117_v63 = vrot.slane %v1107_v61, 1  ;;  %v1118_v58 = vrot.slane %v1108_v24, 1  ;;  %v1119_v4 = vrot.slane %v1109_v31, 1  ;;  %v1135_v13 = vunpack.c.l.bf16 %v1788_v46 }
  0xaa   : > { %v1136_v8 = vunpack.c.l.bf16 %v1789_v26  ;;  %v1137_v54 = vunpack.c.l.bf16 %v1790_v33  ;;  %v1125_v18 = vadd.f32 %v1115_v22, %v1086_v21  ;;  %v1126_v2 = vadd.f32 %v1116_v52, %v1087_v17 }
  0xab   : > { %v1127_v47 = vadd.f32 %v1117_v63, %v1088_v60  ;;  %v1138_v57 = vunpack.c.l.bf16 %v1791_v45  ;;  %v1139_v25 = vunpack.c.l.bf16 %v1792_v41  ;;  %v1144_v39 = vmul.f32 %v1793_v42, %v1135_v13 }
  0xac   : > { %v1145_v55 = vmul.f32 %v1793_v42, %v1136_v8  ;;  %v1146_v34 = vmul.f32 %v1793_v42, %v1137_v54  ;;  %v1128_v0 = vadd.f32 %v1118_v58, %v1089_v38  ;;  %v1129_v9 = vadd.f32 %v1119_v4, %v1090_v62 }
  0xad   : > { %v1147_v51 = vmul.f32 %v1793_v42, %v1138_v57  ;;  %v1148_v1 = vmul.f32 %v1793_v42, %v1139_v25  ;;  %v1154_v56 = vrot.slane %v1144_v39, 2  ;;  %v2169_v31 = vmov 1983009808  }
  0xae   : > { %v1155_v50 = vrot.slane %v1145_v55, 2  ;;  %v1156_v53 = vrot.slane %v1146_v34, 2  ;;  %v1228_v26 = vunpack.c.l.s4 %v2169_v31 }
  0xaf   : > { %v1157_v35 = vrot.slane %v1147_v51, 2  ;;  %v1158_v19 = vrot.slane %v1148_v1, 2  ;;  %v1164_v20 = vadd.f32 %v1154_v56, %v1125_v18 }
  0xb0   : > { %v1165_v27 = vadd.f32 %v1155_v50, %v1126_v2  ;;  %v1166_v32 = vadd.f32 %v1156_v53, %v1127_v47  ;;  %v1229_v42 = vunpack.c.0.s8 %v1228_v26 }
  0xb1   : > { %v1167_v14 = vadd.f32 %v1157_v35, %v1128_v0  ;;  %v1168_v59 = vadd.f32 %v1158_v19, %v1129_v9  ;;  %v1176_v5 = vadd.f32 %v1794_v36, %v1164_v20 }
  0xb2   : > { %v1177_v15 = vadd.f32 %v1794_v36, %v1165_v27  ;;  %v1178_v48 = vadd.f32 %v1794_v36, %v1166_v32  ;;  %v1232_v38 = vsub.s32 %v1229_v42, %v2325_v3 }
  0xb3   : > { %v1179_v23 = vadd.f32 %v1794_v36, %v1167_v14  ;;  %v1180_v30 = vadd.f32 %v1794_v36, %v1168_v59  ;;  %v1181_v28 = vsub.f32 0.0, %v1176_v5 }
  0xb4   : > { %v1182_v16 = vsub.f32 0.0, %v1177_v15  ;;  %v1183_v10 = vsub.f32 0.0, %v1178_v48 }
  0xb5   : > { %v1184_v37 = vsub.f32 0.0, %v1179_v23  ;;  %v1185_v29 = vsub.f32 0.0, %v1180_v30  ;;  %v1186_v12 = vmul.f32 1.442695, %v1181_v28 }
  0xb6   : > { %v1188_v6 = vmul.f32 1.442695, %v1182_v16  ;;  %v1190_v40 = vmul.f32 1.442695, %v1183_v10 }
  0xb7   : > { %v1192_v44 = vmul.f32 1.442695, %v1184_v37  ;;  %2037 = vpow2.f32 %v1186_v12  ;;  %v1194_v11 = vmul.f32 1.442695, %v1185_v29 }
  0xb8   : > { %2039 = vpow2.f32 %v1188_v6 }
  0xb9   : > { %2041 = vpow2.f32 %v1190_v40 }
  0xba   : > { %2043 = vpow2.f32 %v1192_v44 }
  0xbb   : > { %2045 = vpow2.f32 %v1194_v11 }
  0xc1   : > { %v2038_v49 = vpop.eup %2037 }
  0xc2   : > { %v2040_v7 = vpop.eup %2039  ;;  %v1196_v43 = vadd.f32 1.0, %v2038_v49 }
  0xc3   : > { %v2042_v21 = vpop.eup %2041  ;;  %v1197_v61 = vadd.f32 1.0, %v2040_v7 }
  0xc4   : > { %v2044_v46 = vpop.eup %2043  ;;  %v1198_v17 = vadd.f32 1.0, %v2042_v21  ;;  %2047 = vrcp.f32 %v1196_v43 }
  0xc5   : > { %v2046_v60 = vpop.eup %2045  ;;  %v1199_v24 = vadd.f32 1.0, %v2044_v46  ;;  %2049 = vrcp.f32 %v1197_v61 }
  0xc6   : > { %v1200_v33 = vadd.f32 1.0, %v2046_v60  ;;  %2051 = vrcp.f32 %v1198_v17 }
  0xc7   : > { %2053 = vrcp.f32 %v1199_v24 }
  0xc8   : > { %2055 = vrcp.f32 %v1200_v33 }
  0xce   : > { %v2048_v62 = vpop.eup %2047 }
  0xcf   : > { %v2050_v22 = vpop.eup %2049  ;;  %v1206_v52 = vmul.f32 %v2048_v62, %v1176_v5 }
  0xd0   : > { %v2052_v45 = vpop.eup %2051  ;;  %v1207_v63 = vmul.f32 %v2050_v22, %v1177_v15 }
  0xd1   : > { %v2054_v58 = vpop.eup %2053  ;;  %v1208_v4 = vmul.f32 %v2052_v45, %v1178_v48  ;;  %v1211_v41 = vpack.c.bf16 %v1206_v52, %v1206_v52  ;;  %v1226_v13 = vcombine.high %v1206_v52, %v1206_v52  ;;  %v1233_v8 = vrot.slane %v1206_v52, %v1232_v38  ;;  %v1406_v52 = vld [vmem:[%s2799_s4] sm:$0x1] }
  0xd2   : > { %v2056_v54 = vpop.eup %2055  ;;  %v1209_v3 = vmul.f32 %v2054_v58, %v1179_v23  ;;  %v1212_v18 = vpack.c.bf16 %v1207_v63, %v1207_v63  ;;  %v1242_v2 = vcombine.high %v1207_v63, %v1207_v63  ;;  %v1249_v47 = vrot.slane %v1207_v63, %v1232_v38 }
  0xd3   : > { %v1210_v57 = vmul.f32 %v2056_v54, %v1180_v30  ;;  %v1213_v25 = vpack.c.bf16 %v1208_v4, %v1208_v4  ;;  %1216 = vst [vmem:[%s2730_s13] sm:$0x7] %v1211_v41  ;;  %v1240_v39 = vrot.slane %v1226_v13, %v1232_v38  ;;  %v1241_v55 = vcombine.high %v1233_v8, %v1233_v8 }
  0xd4   : > { %v1214_v34 = vpack.c.bf16 %v1209_v3, %v1209_v3  ;;  %1217 = vst [vmem:[%s2730_s13 + $0x4] sm:$0x7] %v1212_v18  ;;  %v1256_v0 = vrot.slane %v1242_v2, %v1232_v38  ;;  %v1257_v9 = vcombine.high %v1249_v47, %v1249_v47  ;;  %v1258_v51 = vcombine.high %v1208_v4, %v1208_v4  ;;  %v1484_v18 = vld [vmem:[%s2801_s6] sm:$0x1] }
  0xd5   : > { %v1215_v1 = vpack.c.bf16 %v1210_v57, %v1210_v57  ;;  %1218 = vst [vmem:[%s2730_s13 + $0x8] sm:$0x7] %v1213_v25  ;;  %v1265_v56 = vrot.slane %v1208_v4, %v1232_v38  ;;  %v1274_v50 = vcombine.high %v1209_v3, %v1209_v3  ;;  %v1281_v53 = vrot.slane %v1209_v3, %v1232_v38 }
  0xd6   : > { %1219 = vst [vmem:[%s2730_s13 + $0xc] sm:$0x7] %v1214_v34  ;;  %v1272_v35 = vrot.slane %v1258_v51, %v1232_v38  ;;  %v1290_v36 = vcombine.high %v1210_v57, %v1210_v57  ;;  %v1297_v19 = vrot.slane %v1210_v57, %v1232_v38  ;;  %v1306_v20 = vcombine.low %v1233_v8, %v1241_v55 }
  0xd7   : > { %1220 = vst [vmem:[%s2730_s13 + $0x10] sm:$0x7] %v1215_v1  ;;  %v1273_v27 = vcombine.high %v1265_v56, %v1265_v56  ;;  %v1288_v32 = vrot.slane %v1274_v50, %v1232_v38  ;;  %v1289_v14 = vcombine.high %v1281_v53, %v1281_v53  ;;  %v1307_v59 = vcombine.low %v1240_v39, %v1249_v47  ;;  %s1571_s13 = scalar_lea.sflag [#allocation4], %s2314_s19 }
  0xd8   : > { %v1304_v5 = vrot.slane %v1290_v36, %v1232_v38  ;;  %v1305_v15 = vcombine.high %v1297_v19, %v1297_v19  ;;  %v1314_v48 = vrot.slane %v1306_v20, %v1232_v38  ;;  %v1323_v23 = vcombine.low %v1257_v9, %v1256_v0 }
  0xd9   : > { %v1321_v30 = vrot.slane %v1307_v59, %v1232_v38  ;;  %v1324_v28 = vcombine.low %v1265_v56, %v1273_v27  ;;  %v1340_v16 = vcombine.low %v1272_v35, %v1281_v53  ;;  %v1341_v10 = vcombine.low %v1289_v14, %v1288_v32 }
  0xda   : > { %v1331_v37 = vrot.slane %v1323_v23, %v1232_v38  ;;  %v1357_v29 = vcombine.low %v1297_v19, %v1305_v15  ;;  %v1371_v12 = vrot.slane %v1304_v5, %v1232_v38 }
  0xdb   : > { %v1322_v6 = vcombine.low %v1314_v48, %v1321_v30  ;;  %v1338_v40 = vrot.slane %v1324_v28, %v1232_v38  ;;  %v1348_v44 = vrot.slane %v1340_v16, %v1232_v38  ;;  %v1355_v11 = vrot.slane %v1341_v10, %v1232_v38 }
  0xdc   : > { %v1364_v49 = vrot.slane %v1357_v29, %v1232_v38  ;;  %v1483_v38 = vld [vmem:[%s2800_s5] sm:$0xff] }
  0xdd   : > { %v1339_v7 = vcombine.low %v1331_v37, %v1338_v40  ;;  %v1356_v43 = vcombine.low %v1348_v44, %v1355_v11  ;;  %1953 = vmatpush3.msra.mxu1 %v1483_v38 }
  0xde   : > { %v1372_v21 = vcombine.low %v1364_v49, %v1371_v12 }
  0xdf   : > { %v1377_v61 = vadd.f32 %v1339_v7, %v1322_v6 }
  0xe0   : > { %v1380_v46 = vsel %vm1379_vm1, %v1372_v21, 0.0 }
  0xe1   : > { %v1378_v17 = vadd.f32 %v1377_v61, %v1356_v43 }
  0xe3   : > { %v1381_v60 = vadd.f32 %v1380_v46, %v1378_v17 }
  0xe5   : > { %v1382_v24 = vrot.slane %v1381_v60, 4 }
  0xe7   : > { %v1383_v31 = vadd.f32 %v1382_v24, %v1381_v60 }
  0xe9   : > { %v1384_v26 = vrot.slane %v1383_v31, 2 }
  0xeb   : > { %v1385_v33 = vadd.f32 %v1384_v26, %v1383_v31 }
  0xed   : > { %v1386_v42 = vrot.slane %v1385_v33, 1 }
  0xef   : > { %v1387_v62 = vadd.f32 %v1386_v42, %v1385_v33 }
  0xf1   : > { %v1389_v22 = vmul.f32 0.033333335, %v1387_v62 }
  0xf3   : > { %1950 = vmatmul.mubr.f32.vlgmr.msra.gmra.mrb[0].mxu0 %v1389_v22 }
 0x1c6   : > { %v1473_v45 = vpop.f32.mrb[0].mxu0 }
 0x1c7   : > { %v1474_v63 = vadd.f32 %v1473_v45, %v1406_v52  ;;  %v1951_v58 = vpop.f32.mrb[1].mxu0 }
 0x1c9   : > { %v1477_v4 = vsub.f32 0.0, %v1474_v63 }
 0x1cb   : > { %v1478_v41 = vmul.f32 1.442695, %v1477_v4 }
 0x1cd   : > { %2057 = vpow2.f32 %v1478_v41 }
 0x1d7   : > { %v2058_v13 = vpop.eup %2057 }
 0x1d8   : > { %v1480_v8 = vadd.f32 1.0, %v2058_v13 }
 0x1da   : > { %2059 = vrcp.f32 %v1480_v8 }
 0x1e4   : > { %v2060_v54 = vpop.eup %2059 }
 0x1e5   : > { %v1482_v3 = vmul.f32 %v2060_v54, %v1474_v63 }
 0x1e7   : > { %1955 = vmatmul.mubr.msk.f32.vlgmr.msra.gmra.mrb[0].mxu1 %vm1485_vm2, %v1482_v3 }
 0x2ba   : > { %v1555_v2 = vpop.f32.mrb[0].mxu1 }
 0x2bb   : > { %v1556_v47 = vadd.f32 %v1555_v2, %v1484_v18  ;;  %v1956_v57 = vpop.f32.mrb[1].mxu1 }
 0x2bd   : > { %v1559_v25 = vsub.f32 0.0, %v1556_v47 }
 0x2bf   : > { %v1560_v39 = vmul.f32 1.442695, %v1559_v25 }
 0x2c1   : > { %2061 = vpow2.f32 %v1560_v39 }
 0x2cb   : > { %v2062_v55 = vpop.eup %2061 }
 0x2cc   : > { %v1562_v34 = vadd.f32 1.0, %v2062_v55 }
 0x2ce   : > { %2063 = vrcp.f32 %v1562_v34 }
 0x2d8   : > { %v2064_v0 = vpop.eup %2063 }
 0x2d9   : > { %1564 = vst [vmem:[%s330_s15] sm:$0x1] %v2064_v0 }
 0x2da   : > { %2108 = shalt.err (!%p2105_p4)
}
 0x2db   : > { %s2109_s19 = scalar_lea.hbm %s2751_s12, 16  ;;  %s2113_s10 = scalar_lea.hbm %s2803_s8, 32 }
 0x2dc   : > { %p2110_p5 = scmp.ne.s32.totalorder %s2751_s12, %s2109_s19  ;;  %p2114_p1 = scmp.lt.u32.totalorder %s2751_s12, %s2803_s8 }
 0x2dd   : > { %p2115_p3 = scmp.lt.u32.totalorder %s2113_s10, %s2109_s19  ;;  %p2117_p11 = scmp.lt.u32.totalorder %s2109_s19, %s2751_s12 }
 0x2de   : > { %p2111_p7 = pnand %p2110_p5, %p2810_p12 }
 0x2df   : > { %p2116_p6 = por %p2115_p3, %p2114_p1 }
 0x2e0   : > { %p2112_p9 = pneg %p2111_p7 }
 0x2e1   : > { %p2118_p13 = por %p2117_p11, %p2116_p6 }
 0x2e3   : > { %p2119_p8 = pnand %p2118_p13, %p2112_p9 }
 0x2e5   : > { %2122 = shalt.err (!%p2119_p8)
}
 0x2e6   : > { %1987 = dma.vmem_to_hbm [thread:$0]  (%p2810_p12), %s2753_s20, 16, %s2751_s12, %s1571_s13  }
 0x2e7 PF: > { %s1606_s25 = sand.u32 1, %s2149_s27   ;;  %p2811_p10 = scmp.ne.s32.totalorder %s2808_s17, 0 }
 0x2e8   : > { %p2812_p0 = scmp.ge.s32.totalorder %s2161_s30, 2  ;;  %s1607_s14 = scalar_lea.sflag [#allocation4], %s1606_s25 }
 0x2ea   : > { %p1994_p2 = pnand %p2812_p0, %p2811_p10 }
 0x2ec   : > { %2144 = dma.done.wait (!%p1994_p2), %s1607_s14, 16  }
 0x2ed   : > { %2146 = vsyncadd (!%p1994_p2), %s1607_s14, 4294967280  ;;  %s2813_s21 = sld [smem:[#allocation8_spill]]  ;;  %p22_p4 = scmp.ge.s32.totalorder %s2241_s11, 4  }
 0x2ee   : > { %s2814_s27 = smov %s2153_s28  ;;  %s2815_s28 = smov %s2157_s29 }
 0x2ef   : > { %s2817_s30 = smov %s2241_s11  ;;  %24 = sbr.rel (!%p22_p4) target bundleno = 5 (0x5), region = 114 }
 0x2f3   : > { %s2816_s29 = smov %s2813_s21 }
 0x2f6   :  { %1611 = vsyncpa [#allocation3], 1 }
 0x2f7   :  { %1613 = vsyncpa [#allocation3 + $0x1], 1 }
 0x2f8   :  { %1614 = vsyncpa [#allocation4], 1 }
 0x2f9   :  { %1616 = vsyncpa [#allocation4 + $0x1], 1 }

</bundles_post_ra>
